<compile_context>
chip_gen: v6e
topology: v6e:2x2x1
jax: 0.10.0
libtpu: 0.0.40
codegen_flags: <defaults>
</compile_context>

<pallas_src>
import functools

import jax
import jax.numpy as jnp
from jax.experimental import pallas as pl
from jax.experimental.pallas import tpu as pltpu

F32 = jnp.float32
BF16 = jnp.bfloat16
I32 = jnp.int32

LPAD = 128          # lane padding used for both raw-feature and hidden dims
NEG = -1e30
POS = 1e30

EDGE_TYPES = (
    ("part", "to", "torque"),
    ("torque", "to", "part"),
    ("part", "to", "force"),
    ("force", "to", "part"),
)


# ----------------------------------------------------------------------------
# small pallas_call helpers
# ----------------------------------------------------------------------------
def _zero_map(nd):
    return lambda i: (0,) * nd


def _full_spec(a):
    n = a.ndim
    return pl.BlockSpec(a.shape, _zero_map(n))


def _per_step_spec(a):
    n = a.ndim
    return pl.BlockSpec((1,) + tuple(a.shape[1:]),
                        lambda l: (l,) + (0,) * (n - 1))


def _pcall(kernel, out_shapes, *args):
    """Run `kernel` once with full-array VMEM blocks (grid=(1,))."""
    out_shape = tuple(jax.ShapeDtypeStruct(tuple(s), F32) for s in out_shapes)
    out_specs = tuple(pl.BlockSpec(tuple(s), _zero_map(len(s)))
                      for s in out_shapes)
    return pl.pallas_call(
        kernel,
        grid=(1,),
        out_shape=out_shape,
        in_specs=[_full_spec(a) for a in args],
        out_specs=out_specs,
    )(*args)


# ----------------------------------------------------------------------------
# Kernel 1: fused hetero-GAT stack (embedding + encoder layers + actor layer)
# ----------------------------------------------------------------------------
def _gat_stack_kernel(mass_ref, oneh_ref, wg_ref, we_ref, t0_ref, f0_ref,
                      bp_row_ref, bp_col_ref, bt_row_ref, bt_col_ref,
                      bf_row_ref, bf_col_ref,
                      wp_ref, wt_ref, wf_ref, atts_ref, bias_ref,
                      h_part_ref, h_torque_ref, h_force_ref, actor_part_ref,
                      part_s, torque_s, force_s):
    l = pl.program_id(0)
    nsteps = pl.num_programs(0)          # encoder layers + 1 actor layer
    HP = h_part_ref.shape[1]             # == LPAD

    # ---- step 0: initial node features (part embedding; padded raw features)
    @pl.when(l == 0)
    def _init():
        part_s[...] = mass_ref[...] * wg_ref[...] + jnp.dot(
            oneh_ref[...], we_ref[...], preferred_element_type=F32)
        torque_s[...] = t0_ref[...]
        force_s[...] = f0_ref[...]

    # inter-layer ReLU: inputs of encoder layers 2..L only (not the actor conv)
    relu = jnp.logical_and(l >= 1, l <= nsteps - 2)

    def load(sref):
        x = sref[...]
        return jnp.where(relu, jnp.maximum(x, 0.0), x).astype(BF16)

    xp = load(part_s)                    # [Np, LPAD] bf16
    xt = load(torque_s)                  # [Nt, LPAD]
    xf = load(force_s)                   # [Nf, LPAD]

    # fused per-layer weights: ONE matmul per source node type (instead of 8
    # per-edge matmuls); dst-attention vectors folded in as extra columns.
    wp = wp_ref[0]                       # [LPAD, 3*LPAD] bf16
    wt = wt_ref[0]                       # [LPAD, 2*LPAD]
    wf = wf_ref[0]                       # [LPAD, 2*LPAD]
    atts = atts_ref[0]                   # [4, LPAD] f32 src attention vectors
    bias = bias_ref[0]                   # [4, LPAD] f32 per-edge-type bias

    pp = jnp.dot(xp, wp, preferred_element_type=F32)    # [Np, 3*LPAD]
    tt = jnp.dot(xt, wt, preferred_element_type=F32)    # [Nt, 2*LPAD]
    ff = jnp.dot(xf, wf, preferred_element_type=F32)    # [Nf, 2*LPAD]

    # block-diagonal adjacency masks rebuilt in-kernel from graph-id vectors
    adj_t_p = bt_col_ref[...] == bp_row_ref[...]        # [Nt, Np]  part -> torque
    adj_p_t = bp_col_ref[...] == bt_row_ref[...]        # [Np, Nt]  torque -> part
    adj_f_p = bf_col_ref[...] == bp_row_ref[...]        # [Nf, Np]  part -> force
    adj_p_f = bp_col_ref[...] == bf_row_ref[...]        # [Np, Nf]  force -> part

    def conv(e, hs, a_d, adj):
        # GATConv(heads=1, add_self_loops=False) as dense masked attention.
        # TODO(synk): flash-tile the [Nd,Ns] logits for large graphs.
        a_s = jax.lax.dot_general(atts[e:e + 1, :], hs,
                                  (((1,), (1,)), ((), ())),
                                  preferred_element_type=F32)       # [1, Ns]
        logit = a_d + a_s                                           # [Nd, Ns]
        logit = jnp.where(logit > 0, logit, 0.2 * logit)            # LeakyReLU
        logit = jnp.where(adj, logit, NEG)
        m = jnp.max(logit, axis=-1, keepdims=True)
        p = jnp.where(adj, jnp.exp(logit - m), 0.0)
        denom = jnp.sum(p, axis=-1, keepdims=True) + 1e-16          # PyG eps
        alpha = (p * pl.reciprocal(denom, approx=True)).astype(BF16)
        out = jnp.dot(alpha, hs.astype(BF16), preferred_element_type=F32)
        # isolated dst nodes degenerate to bias-only output (matches PyG).
        return out + bias[e:e + 1, :]

    # edge order: 0: p->t, 1: t->p, 2: p->f, 3: f->p ; to_hetero aggr='sum'
    new_torque = conv(0, pp[:, 0:HP], tt[:, HP:HP + 1], adj_t_p)
    new_part = (conv(1, tt[:, 0:HP], pp[:, 2 * HP:2 * HP + 1], adj_p_t)
                + conv(3, ff[:, 0:HP], pp[:, 2 * HP + 1:2 * HP + 2], adj_p_f))
    new_force = conv(2, pp[:, HP:2 * HP], ff[:, HP:HP + 1], adj_f_p)

    # carry to the next layer (VMEM-resident between grid steps)
    part_s[...] = new_part
    torque_s[...] = new_torque
    force_s[...] = new_force

    @pl.when(l == nsteps - 2)            # output of the last encoder layer (h)
    def _store_h():
        h_part_ref[...] = new_part
        h_torque_ref[...] = new_torque
        h_force_ref[...] = new_force

    @pl.when(l == nsteps - 1)            # actor conv output (part nodes)
    def _store_actor():
        actor_part_ref[...] = new_part


def _run_gat_stack(params, mass, oneh, t0, f0,
                   bp_row, bp_col, bt_row, bt_col, bf_row, bf_col):
    n_p, n_t, n_f = mass.shape[0], t0.shape[0], f0.shape[0]
    steps = params["WP"].shape[0]

    args = (mass, oneh, params["wg_pad"], params["we_pad"], t0, f0,
            bp_row, bp_col, bt_row, bt_col, bf_row, bf_col,
            params["WP"], params["WT"], params["WF"],
            params["ATTS"], params["BIAS"])
    in_specs = ([_full_spec(a) for a in args[:12]]
                + [_per_step_spec(a) for a in args[12:]])
    out_shape = tuple(jax.ShapeDtypeStruct((n, LPAD), F32)
                      for n in (n_p, n_t, n_f, n_p))
    out_specs = tuple(pl.BlockSpec((n, LPAD), lambda l: (0, 0))
                      for n in (n_p, n_t, n_f, n_p))
    # TODO(synk): add a leading "parallel" graph-tile grid axis (v7x dual-TC).
    return pl.pallas_call(
        _gat_stack_kernel,
        grid=(steps,),
        out_shape=out_shape,
        in_specs=in_specs,
        out_specs=out_specs,
        scratch_shapes=[pltpu.VMEM((n_p, LPAD), F32),
                        pltpu.VMEM((n_t, LPAD), F32),
                        pltpu.VMEM((n_f, LPAD), F32)],
        compiler_params=pltpu.CompilerParams(
            dimension_semantics=("arbitrary",),   # layer carry lives in scratch
            vmem_limit_bytes=48 * 1024 * 1024),
    )(*args)


# ----------------------------------------------------------------------------
# Kernel 2: fused actor head + per-graph softmax/scatter + full critic
# ----------------------------------------------------------------------------
def _head_critic_kernel(hidden,
                        actor_part_ref, ln_w_ref, ln_b_ref, aw_ref, ab_ref,
                        bp_row_ref, bp_col_ref, pid_col_ref,
                        bt_row_ref, bt_col_ref, bf_row_ref, bf_col_ref,
                        h_part_ref, h_torque_ref, h_force_ref,
                        wcat_ref, bcat_ref, wmlp_ref, bmlp_ref,
                        wout_ref, bout_ref,
                        actions_ref, v_ref):
    B = v_ref.shape[0]
    HP = h_part_ref.shape[1]                 # == LPAD
    n_part = actions_ref.shape[1] // 2
    inv_h = 1.0 / hidden

    iota_b = jax.lax.broadcasted_iota(I32, (B, 1), 0)                # [B,1]
    lane = jax.lax.broadcasted_iota(I32, (1, HP), 1)                 # [1,HP]
    hmask = (lane < hidden).astype(F32)

    bp_row = bp_row_ref[...]
    bp_col = bp_col_ref[...]

    # ---- actor: masked LayerNorm -> Linear(H,2) -> per-graph softmax -> scatter
    x = actor_part_ref[...]                                          # pads == 0
    mu = jnp.sum(x, axis=-1, keepdims=True) * inv_h
    xc = (x - mu) * hmask
    var = jnp.sum(xc * xc, axis=-1, keepdims=True) * inv_h
    xn = xc * jax.lax.rsqrt(var + 1e-5) * ln_w_ref[...] + ln_b_ref[...]
    logits = jnp.dot(xn, aw_ref[...], preferred_element_type=F32) + ab_ref[...]

    memb_p = (iota_b == bp_row).astype(F32)                          # [B, Np]
    membT_p = (bp_col ==
               jax.lax.broadcasted_iota(I32, (1, B), 1)).astype(F32)  # [Np, B]

    def seg_max_body(b, acc):
        row = jnp.max(jnp.where(bp_col == b, logits, NEG),
                      axis=0, keepdims=True)                         # [1, 2]
        return acc + (iota_b == b).astype(F32) * row
    gmax = jax.lax.fori_loop(0, B, seg_max_body, jnp.zeros((B, 2), F32))

    maxpn = jnp.dot(membT_p, gmax, preferred_element_type=F32)       # [Np, 2]
    p = jnp.exp(logits - maxpn)
    segsum = jnp.dot(memb_p, p, preferred_element_type=F32)          # [B, 2]
    denom = jnp.dot(membT_p, segsum, preferred_element_type=F32)     # [Np, 2]
    soft = p * pl.reciprocal(denom + 1e-16, approx=True)             # PyG eps

    # scatter: actions[b, c*n_part + p] = soft[node(b, p), c]   (lane-dense)
    pid_oh = (pid_col_ref[...] ==
              jax.lax.broadcasted_iota(I32, (1, n_part), 1)).astype(F32)
    actions_ref[:, 0:n_part] = jnp.dot(memb_p, pid_oh * soft[:, 0:1],
                                       preferred_element_type=F32)
    actions_ref[:, n_part:2 * n_part] = jnp.dot(memb_p, pid_oh * soft[:, 1:2],
                                                preferred_element_type=F32)

    # ---- critic: per-graph [max|min|mean] per node type -> MLP -> tanh
    def aggregate(h, b_row, b_col):
        memb = (iota_b == b_row).astype(F32)                         # [B, N]
        cnt = jnp.sum(memb, axis=-1, keepdims=True)                  # [B, 1]
        ssum = jnp.dot(memb, h, preferred_element_type=F32)          # [B, HP]
        mean = ssum * pl.reciprocal(jnp.maximum(cnt, 1.0), approx=True)

        def body(b, carry):
            gmx, gmn = carry
            sel = b_col == b
            oh = (iota_b == b).astype(F32)
            gmx = gmx + oh * jnp.max(jnp.where(sel, h, NEG),
                                     axis=0, keepdims=True)
            gmn = gmn + oh * jnp.min(jnp.where(sel, h, POS),
                                     axis=0, keepdims=True)
            return gmx, gmn

        gmx, gmn = jax.lax.fori_loop(
            0, B, body, (jnp.zeros((B, HP), F32), jnp.zeros((B, HP), F32)))
        nonempty = (cnt > 0).astype(F32)   # empty segments -> 0 (guards +/-1e30)
        return gmx * nonempty, gmn * nonempty, mean

    gxp, gnp_, gmp = aggregate(h_part_ref[...], bp_row, bp_col)
    gxt, gnt, gmt = aggregate(h_torque_ref[...], bt_row_ref[...], bt_col_ref[...])
    gxf, gnf, gmf = aggregate(h_force_ref[...], bf_row_ref[...], bf_col_ref[...])

    # critic_concat as ONE long-K matmul over the lane-concatenated aggregates
    cat = jnp.concatenate([gxp, gnp_, gmp, gxt, gnt, gmt, gxf, gnf, gmf],
                          axis=-1)                                    # [B, 9*HP]
    pre = jnp.dot(cat, wcat_ref[...], preferred_element_type=F32) + bcat_ref[...]
    # TODO(synk): tanh-approx GELU (exact erf GELU not guaranteed to lower).
    c0 = 0.7978845608028654
    g = 0.5 * pre * (1.0 + jnp.tanh(c0 * (pre + 0.044715 * pre * pre * pre)))
    hm = jnp.dot(g, wmlp_ref[...], preferred_element_type=F32) + bmlp_ref[...]
    v_ref[...] = jnp.tanh(
        jnp.dot(hm, wout_ref[...], preferred_element_type=F32) + bout_ref[...])


# ----------------------------------------------------------------------------
# Parameters & forward glue
# ----------------------------------------------------------------------------
def init_params(key, hidden, f_dims, num_layers=4):
    assert hidden % 2 == 0 and hidden <= LPAD
    assert max(f_dims.values()) <= LPAD
    keys = iter(jax.random.split(key, 1024))

    def w(shape, scale=0.3):
        return (scale * jax.random.normal(next(keys), shape)).astype(F32)

    h2 = hidden // 2
    steps = num_layers + 1               # encoder layers + actor layer
    raw_dims = {"part": hidden, "torque": f_dims["torque"],
                "force": f_dims["force"]}

    # part embedding: cat([Linear(1,h/2)(mass), Embedding(4,h/2)(state)], -1)
    wg_pad = jnp.zeros((1, LPAD), F32).at[:, :h2].set(w((1, h2)))
    we_pad = jnp.zeros((4, LPAD), F32).at[:, h2:hidden].set(w((4, h2)))

    # fused per-layer weights, lane-blocked by 128:
    #   WP [steps, LPAD, 3*LPAD]: blk0 = WS(p->t), blk1 = WS(p->f),
    #       blk2 col 0 = WD(t->p)@attd, col 1 = WD(f->p)@attd
    #   WT [steps, LPAD, 2*LPAD]: blk0 = WS(t->p), blk1 col 0 = WD(p->t)@attd
    #   WF [steps, LPAD, 2*LPAD]: blk0 = WS(f->p), blk1 col 0 = WD(p->f)@attd
    WP = jnp.zeros((steps, LPAD, 3 * LPAD), F32)
    WT = jnp.zeros((steps, LPAD, 2 * LPAD), F32)
    WF = jnp.zeros((steps, LPAD, 2 * LPAD), F32)
    ATTS = jnp.zeros((steps, 4, LPAD), F32)
    BIAS = jnp.zeros((steps, 4, LPAD), F32)

    for l in range(steps):
        dims = raw_dims if l == 0 else {k: hidden for k in raw_dims}
        for e, (s, _, d) in enumerate(EDGE_TYPES):
            if l == 0:     # lazy (-1,-1) first layer: separate src/dst linears
                ws = w((dims[s], hidden))
                wd = w((dims[d], hidden))
            else:          # GATConv(H,H): single shared linear
                ws = wd = w((hidden, hidden))
            att_s = w((hidden,))
            att_d = w((hidden,))
            b = w((hidden,), 0.1)
            ad_col = wd @ att_d                       # folded dst attention
            ATTS = ATTS.at[l, e, :hidden].set(att_s)
            BIAS = BIAS.at[l, e, :hidden].set(b)
            if e == 0:     # part -> torque
                WP = WP.at[l, :dims[s], 0:hidden].set(ws)
                WT = WT.at[l, :dims[d], LPAD].set(ad_col)
            elif e == 1:   # torque -> part
                WT = WT.at[l, :dims[s], 0:hidden].set(ws)
                WP = WP.at[l, :dims[d], 2 * LPAD].set(ad_col)
            elif e == 2:   # part -> force
                WP = WP.at[l, :dims[s], LPAD:LPAD + hidden].set(ws)
                WF = WF.at[l, :dims[d], LPAD].set(ad_col)
            else:          # force -> part
                WF = WF.at[l, :dims[s], 0:hidden].set(ws)
                WP = WP.at[l, :dims[d], 2 * LPAD + 1].set(ad_col)

    # actor head (lane-padded; pad lanes carry zeros through the whole head)
    ln_w = jnp.zeros((1, LPAD), F32).at[:, :hidden].set(1.0)
    ln_b = jnp.zeros((1, LPAD), F32)
    aw = jnp.zeros((LPAD, 2), F32).at[:hidden, :].set(w((hidden, 2)))
    ab = w((1, 2), 0.1)

    # critic (9 lane-blocks of 128 rows in the concat weight)
    wcat = jnp.zeros((9 * LPAD, LPAD), F32)
    for k in range(9):
        wcat = wcat.at[k * LPAD:k * LPAD + hidden, :hidden].set(
            w((hidden, hidden)))
    bcat = jnp.zeros((1, LPAD), F32).at[:, :hidden].set(w((1, hidden), 0.1))
    wmlp = jnp.zeros((LPAD, LPAD), F32).at[:hidden, :hidden].set(
        w((hidden, hidden)))
    bmlp = jnp.zeros((1, LPAD), F32).at[:, :hidden].set(w((1, hidden), 0.1))
    wout = jnp.zeros((LPAD, 1), F32).at[:hidden, :].set(w((hidden, 1)))
    bout = w((1, 1), 0.1)

    return {
        "hidden": hidden,
        "wg_pad": wg_pad, "we_pad": we_pad,
        "WP": WP.astype(BF16), "WT": WT.astype(BF16), "WF": WF.astype(BF16),
        "ATTS": ATTS, "BIAS": BIAS,
        "ln_w": ln_w, "ln_b": ln_b,
        "actor_out_w": aw, "actor_out_b": ab,
        "critic_concat_w": wcat, "critic_concat_b": bcat,
        "critic_mlp_w": wmlp, "critic_mlp_b": bmlp,
        "critic_out_w": wout, "critic_out_b": bout,
    }


def gat_gftf_shared_encoder_forward(params, inputs):
    hidden = params["hidden"]
    tx, fx = inputs["torque_x"], inputs["force_x"]
    t0 = jnp.zeros((tx.shape[0], LPAD), F32).at[:, :tx.shape[1]].set(tx)
    f0 = jnp.zeros((fx.shape[0], LPAD), F32).at[:, :fx.shape[1]].set(fx)

    bp = inputs["part_batch"].astype(I32)
    bt = inputs["torque_batch"].astype(I32)
    bf = inputs["force_batch"].astype(I32)
    pid = inputs["part_id"].astype(I32)
    bp_row, bp_col = bp.reshape(1, -1), bp.reshape(-1, 1)
    bt_row, bt_col = bt.reshape(1, -1), bt.reshape(-1, 1)
    bf_row, bf_col = bf.reshape(1, -1), bf.reshape(-1, 1)
    pid_col = pid.reshape(-1, 1)

    # kernel 1: embedding + 4 encoder layers + actor layer (one pallas_call)
    h_part, h_torque, h_force, actor_part = _run_gat_stack(
        params, inputs["part_mass"], inputs["part_state_onehot"], t0, f0,
        bp_row, bp_col, bt_row, bt_col, bf_row, bf_col)

    B = int(inputs["num_graphs"])
    n_part = int(inputs["n_part"])

    # kernel 2: actor head + per-graph softmax + scatter + full critic
    actions, v = _pcall(
        functools.partial(_head_critic_kernel, hidden),
        [(B, 2 * n_part), (B, 1)],
        actor_part, params["ln_w"], params["ln_b"],
        params["actor_out_w"], params["actor_out_b"],
        bp_row, bp_col, pid_col, bt_row, bt_col, bf_row, bf_col,
        h_part, h_torque, h_force,
        params["critic_concat_w"], params["critic_concat_b"],
        params["critic_mlp_w"], params["critic_mlp_b"],
        params["critic_out_w"], params["critic_out_b"])
    return actions, v


# ----------------------------------------------------------------------------
# Demo
# ----------------------------------------------------------------------------
if __name__ == "__main__":
    HIDDEN = 8
    B = 2                       # number of graphs
    N_PART = 4                  # parts per graph (== n_part slots)
    T_PER_G, F_PER_G = 3, 2     # torque / force nodes per graph
    F_T, F_F = 6, 3             # raw torque / force feature dims

    NP, NT, NF = B * N_PART, B * T_PER_G, B * F_PER_G

    key = jax.random.PRNGKey(0)
    k_in, k_par = jax.random.split(key)
    ks = jax.random.split(k_in, 4)
    mass = jax.random.normal(ks[0], (NP, 1), F32)
    state = jax.random.randint(ks[1], (NP,), 0, 4)
    onehot = jax.nn.one_hot(state, 4, dtype=F32)
    torque_x = jax.random.normal(ks[2], (NT, F_T), F32)
    force_x = jax.random.normal(ks[3], (NF, F_F), F32)

    batch_p = jnp.repeat(jnp.arange(B), N_PART)
    batch_t = jnp.repeat(jnp.arange(B), T_PER_G)
    batch_f = jnp.repeat(jnp.arange(B), F_PER_G)
    part_id = jnp.tile(jnp.arange(N_PART), B)

    inputs = dict(
        part_mass=mass, part_state_onehot=onehot,
        torque_x=torque_x, force_x=force_x,
        part_batch=batch_p, torque_batch=batch_t, force_batch=batch_f,
        part_id=part_id, n_part=N_PART, num_graphs=B,
    )

    params = init_params(k_par, HIDDEN, {"torque": F_T, "force": F_F})

    actions, v = gat_gftf_shared_encoder_forward(params, inputs)
    jax.block_until_ready((actions, v))
    assert actions.shape == (B, 2 * N_PART)
    assert v.shape == (B, 1)
    assert bool(jnp.all(jnp.isfinite(actions))) and bool(jnp.all(jnp.isfinite(v)))
    print("KERNEL_OK")
</pallas_src>

<mosaic_0001>
module attributes {stable_mosaic.version = 11 : i64} {
  func.func @_gat_stack_kernel(%arg0: i32, %arg1: memref<8x1xf32, #tpu.memory_space<vmem>>, %arg2: memref<8x4xf32, #tpu.memory_space<vmem>>, %arg3: memref<1x128xf32, #tpu.memory_space<vmem>>, %arg4: memref<4x128xf32, #tpu.memory_space<vmem>>, %arg5: memref<6x128xf32, #tpu.memory_space<vmem>>, %arg6: memref<4x128xf32, #tpu.memory_space<vmem>>, %arg7: memref<1x8xi32, #tpu.memory_space<vmem>>, %arg8: memref<8x1xi32, #tpu.memory_space<vmem>>, %arg9: memref<1x6xi32, #tpu.memory_space<vmem>>, %arg10: memref<6x1xi32, #tpu.memory_space<vmem>>, %arg11: memref<1x4xi32, #tpu.memory_space<vmem>>, %arg12: memref<4x1xi32, #tpu.memory_space<vmem>>, %arg13: memref<1x128x384xbf16, #tpu.memory_space<vmem>>, %arg14: memref<1x128x256xbf16, #tpu.memory_space<vmem>>, %arg15: memref<1x128x256xbf16, #tpu.memory_space<vmem>>, %arg16: memref<1x4x128xf32, #tpu.memory_space<vmem>>, %arg17: memref<1x4x128xf32, #tpu.memory_space<vmem>>, %arg18: memref<8x128xf32, #tpu.memory_space<vmem>>, %arg19: memref<6x128xf32, #tpu.memory_space<vmem>>, %arg20: memref<4x128xf32, #tpu.memory_space<vmem>>, %arg21: memref<8x128xf32, #tpu.memory_space<vmem>>, %arg22: memref<8x128xf32, #tpu.memory_space<vmem>>, %arg23: memref<6x128xf32, #tpu.memory_space<vmem>>, %arg24: memref<4x128xf32, #tpu.memory_space<vmem>>) attributes {dimension_semantics = [#tpu.dimension_semantics<arbitrary>], iteration_bounds = array<i64: 5>, scalar_prefetch = 0 : i64, scratch_operands = 3 : i64, tpu.core_type = #tpu.core_type<tc>, window_params = [{pipeline_mode = #tpu.pipeline_mode<synchronous>, transform_indices = @transform_0, window_bounds = array<i64: 8, 1>}, {pipeline_mode = #tpu.pipeline_mode<synchronous>, transform_indices = @transform_1, window_bounds = array<i64: 8, 4>}, {pipeline_mode = #tpu.pipeline_mode<synchronous>, transform_indices = @transform_2, window_bounds = array<i64: 1, 128>}, {pipeline_mode = #tpu.pipeline_mode<synchronous>, transform_indices = @transform_3, window_bounds = array<i64: 4, 128>}, {pipeline_mode = #tpu.pipeline_mode<synchronous>, transform_indices = @transform_4, window_bounds = array<i64: 6, 128>}, {pipeline_mode = #tpu.pipeline_mode<synchronous>, transform_indices = @transform_5, window_bounds = array<i64: 4, 128>}, {pipeline_mode = #tpu.pipeline_mode<synchronous>, transform_indices = @transform_6, window_bounds = array<i64: 1, 8>}, {pipeline_mode = #tpu.pipeline_mode<synchronous>, transform_indices = @transform_7, window_bounds = array<i64: 8, 1>}, {pipeline_mode = #tpu.pipeline_mode<synchronous>, transform_indices = @transform_8, window_bounds = array<i64: 1, 6>}, {pipeline_mode = #tpu.pipeline_mode<synchronous>, transform_indices = @transform_9, window_bounds = array<i64: 6, 1>}, {pipeline_mode = #tpu.pipeline_mode<synchronous>, transform_indices = @transform_10, window_bounds = array<i64: 1, 4>}, {pipeline_mode = #tpu.pipeline_mode<synchronous>, transform_indices = @transform_11, window_bounds = array<i64: 4, 1>}, {transform_indices = @transform_12, window_bounds = array<i64: 1, 128, 384>}, {transform_indices = @transform_13, window_bounds = array<i64: 1, 128, 256>}, {transform_indices = @transform_14, window_bounds = array<i64: 1, 128, 256>}, {transform_indices = @transform_15, window_bounds = array<i64: 1, 4, 128>}, {transform_indices = @transform_16, window_bounds = array<i64: 1, 4, 128>}, {pipeline_mode = #tpu.pipeline_mode<synchronous>, transform_indices = @transform_17, window_bounds = array<i64: 8, 128>}, {pipeline_mode = #tpu.pipeline_mode<synchronous>, transform_indices = @transform_18, window_bounds = array<i64: 6, 128>}, {pipeline_mode = #tpu.pipeline_mode<synchronous>, transform_indices = @transform_19, window_bounds = array<i64: 4, 128>}, {pipeline_mode = #tpu.pipeline_mode<synchronous>, transform_indices = @transform_20, window_bounds = array<i64: 8, 128>}]} {
    %c0_i32 = arith.constant 0 : i32
    %0 = arith.cmpi eq, %arg0, %c0_i32 : i32
    %1 = arith.extui %0 : i1 to i32
    %c0_i32_0 = arith.constant 0 : i32
    %2 = arith.cmpi ne, %1, %c0_i32_0 : i32
    scf.if %2 {
      %c0_87 = arith.constant 0 : index
      %c0_88 = arith.constant 0 : index
      %200 = vector.load %arg1[%c0_87, %c0_88] : memref<8x1xf32, #tpu.memory_space<vmem>>, vector<8x1xf32>
      %c0_89 = arith.constant 0 : index
      %c0_90 = arith.constant 0 : index
      %201 = vector.load %arg3[%c0_89, %c0_90] : memref<1x128xf32, #tpu.memory_space<vmem>>, vector<1x128xf32>
      %202 = vector.broadcast %200 : vector<8x1xf32> to vector<8x128xf32>
      %203 = vector.broadcast %201 : vector<1x128xf32> to vector<8x128xf32>
      %204 = arith.mulf %202, %203 : vector<8x128xf32>
      %c0_91 = arith.constant 0 : index
      %c0_92 = arith.constant 0 : index
      %205 = vector.load %arg2[%c0_91, %c0_92] : memref<8x4xf32, #tpu.memory_space<vmem>>, vector<8x4xf32>
      %c0_93 = arith.constant 0 : index
      %c0_94 = arith.constant 0 : index
      %206 = vector.load %arg4[%c0_93, %c0_94] : memref<4x128xf32, #tpu.memory_space<vmem>>, vector<4x128xf32>
      %cst_95 = arith.constant dense<0.000000e+00> : vector<8x128xf32>
      %207 = tpu.matmul %205, %206, %cst_95 {dimension_numbers = #tpu.dot_dimension_numbers<[1], [0], [0], [1], [0, 0, 1, 1], [], []>} : vector<8x4xf32>, vector<4x128xf32>, vector<8x128xf32> -> vector<8x128xf32>
      %208 = arith.addf %204, %207 : vector<8x128xf32>
      %c0_96 = arith.constant 0 : index
      %c0_97 = arith.constant 0 : index
      %209 = vector.load %arg22[%c0_96, %c0_97] : memref<8x128xf32, #tpu.memory_space<vmem>>, vector<8x128xf32>
      tpu.vector_store %arg22[%c0_96, %c0_97], %208 {strides = array<i32>} : memref<8x128xf32, #tpu.memory_space<vmem>>, vector<8x128xf32>,
      %c0_98 = arith.constant 0 : index
      %c0_99 = arith.constant 0 : index
      %210 = vector.load %arg5[%c0_98, %c0_99] : memref<6x128xf32, #tpu.memory_space<vmem>>, vector<6x128xf32>
      %c0_100 = arith.constant 0 : index
      %c0_101 = arith.constant 0 : index
      %211 = vector.load %arg23[%c0_100, %c0_101] : memref<6x128xf32, #tpu.memory_space<vmem>>, vector<6x128xf32>
      tpu.vector_store %arg23[%c0_100, %c0_101], %210 {strides = array<i32>} : memref<6x128xf32, #tpu.memory_space<vmem>>, vector<6x128xf32>,
      %c0_102 = arith.constant 0 : index
      %c0_103 = arith.constant 0 : index
      %212 = vector.load %arg6[%c0_102, %c0_103] : memref<4x128xf32, #tpu.memory_space<vmem>>, vector<4x128xf32>
      %c0_104 = arith.constant 0 : index
      %c0_105 = arith.constant 0 : index
      %213 = vector.load %arg24[%c0_104, %c0_105] : memref<4x128xf32, #tpu.memory_space<vmem>>, vector<4x128xf32>
      tpu.vector_store %arg24[%c0_104, %c0_105], %212 {strides = array<i32>} : memref<4x128xf32, #tpu.memory_space<vmem>>, vector<4x128xf32>,
    } else {
    }
    %c1_i32 = arith.constant 1 : i32
    %3 = arith.cmpi sge, %arg0, %c1_i32 : i32
    %c3_i32 = arith.constant 3 : i32
    %4 = arith.cmpi sle, %arg0, %c3_i32 : i32
    %5 = arith.andi %3, %4 : i1
    %c0 = arith.constant 0 : index
    %c0_1 = arith.constant 0 : index
    %6 = vector.load %arg22[%c0, %c0_1] : memref<8x128xf32, #tpu.memory_space<vmem>>, vector<8x128xf32>
    %cst = arith.constant 0.000000e+00 : f32
    %7 = vector.broadcast %cst : f32 to vector<8x128xf32>
    %8 = arith.maximumf %6, %7 : vector<8x128xf32>
    %9 = arith.select %5, %8, %6 : vector<8x128xf32>
    %10 = arith.truncf %9 : vector<8x128xf32> to vector<8x128xbf16>
    %c0_2 = arith.constant 0 : index
    %c0_3 = arith.constant 0 : index
    %11 = vector.load %arg23[%c0_2, %c0_3] : memref<6x128xf32, #tpu.memory_space<vmem>>, vector<6x128xf32>
    %cst_4 = arith.constant 0.000000e+00 : f32
    %12 = vector.broadcast %cst_4 : f32 to vector<6x128xf32>
    %13 = arith.maximumf %11, %12 : vector<6x128xf32>
    %14 = arith.select %5, %13, %11 : vector<6x128xf32>
    %15 = arith.truncf %14 : vector<6x128xf32> to vector<6x128xbf16>
    %c0_5 = arith.constant 0 : index
    %c0_6 = arith.constant 0 : index
    %16 = vector.load %arg24[%c0_5, %c0_6] : memref<4x128xf32, #tpu.memory_space<vmem>>, vector<4x128xf32>
    %cst_7 = arith.constant 0.000000e+00 : f32
    %17 = vector.broadcast %cst_7 : f32 to vector<4x128xf32>
    %18 = arith.maximumf %16, %17 : vector<4x128xf32>
    %19 = arith.select %5, %18, %16 : vector<4x128xf32>
    %20 = arith.truncf %19 : vector<4x128xf32> to vector<4x128xbf16>
    %c0_8 = arith.constant 0 : index
    %c0_9 = arith.constant 0 : index
    %c0_10 = arith.constant 0 : index
    %21 = vector.load %arg13[%c0_8, %c0_9, %c0_10] : memref<1x128x384xbf16, #tpu.memory_space<vmem>>, vector<1x128x384xbf16>
    %22 = vector.shape_cast %21 : vector<1x128x384xbf16> to vector<128x384xbf16>
    %c0_11 = arith.constant 0 : index
    %c0_12 = arith.constant 0 : index
    %c0_13 = arith.constant 0 : index
    %23 = vector.load %arg14[%c0_11, %c0_12, %c0_13] : memref<1x128x256xbf16, #tpu.memory_space<vmem>>, vector<1x128x256xbf16>
    %24 = vector.shape_cast %23 : vector<1x128x256xbf16> to vector<128x256xbf16>
    %c0_14 = arith.constant 0 : index
    %c0_15 = arith.constant 0 : index
    %c0_16 = arith.constant 0 : index
    %25 = vector.load %arg15[%c0_14, %c0_15, %c0_16] : memref<1x128x256xbf16, #tpu.memory_space<vmem>>, vector<1x128x256xbf16>
    %26 = vector.shape_cast %25 : vector<1x128x256xbf16> to vector<128x256xbf16>
    %c0_17 = arith.constant 0 : index
    %c0_18 = arith.constant 0 : index
    %c0_19 = arith.constant 0 : index
    %27 = vector.load %arg16[%c0_17, %c0_18, %c0_19] : memref<1x4x128xf32, #tpu.memory_space<vmem>>, vector<1x4x128xf32>
    %28 = vector.shape_cast %27 : vector<1x4x128xf32> to vector<4x128xf32>
    %c0_20 = arith.constant 0 : index
    %c0_21 = arith.constant 0 : index
    %c0_22 = arith.constant 0 : index
    %29 = vector.load %arg17[%c0_20, %c0_21, %c0_22] : memref<1x4x128xf32, #tpu.memory_space<vmem>>, vector<1x4x128xf32>
    %30 = vector.shape_cast %29 : vector<1x4x128xf32> to vector<4x128xf32>
    %cst_23 = arith.constant dense<0.000000e+00> : vector<8x384xf32>
    %31 = tpu.matmul %10, %22, %cst_23 {dimension_numbers = #tpu.dot_dimension_numbers<[1], [0], [0], [1], [0, 0, 1, 1], [], []>} : vector<8x128xbf16>, vector<128x384xbf16>, vector<8x384xf32> -> vector<8x384xf32>
    %cst_24 = arith.constant dense<0.000000e+00> : vector<6x256xf32>
    %32 = tpu.matmul %15, %24, %cst_24 {dimension_numbers = #tpu.dot_dimension_numbers<[1], [0], [0], [1], [0, 0, 1, 1], [], []>} : vector<6x128xbf16>, vector<128x256xbf16>, vector<6x256xf32> -> vector<6x256xf32>
    %cst_25 = arith.constant dense<0.000000e+00> : vector<4x256xf32>
    %33 = tpu.matmul %20, %26, %cst_25 {dimension_numbers = #tpu.dot_dimension_numbers<[1], [0], [0], [1], [0, 0, 1, 1], [], []>} : vector<4x128xbf16>, vector<128x256xbf16>, vector<4x256xf32> -> vector<4x256xf32>
    %c0_26 = arith.constant 0 : index
    %c0_27 = arith.constant 0 : index
    %34 = vector.load %arg10[%c0_26, %c0_27] : memref<6x1xi32, #tpu.memory_space<vmem>>, vector<6x1xi32>
    %c0_28 = arith.constant 0 : index
    %c0_29 = arith.constant 0 : index
    %35 = vector.load %arg7[%c0_28, %c0_29] : memref<1x8xi32, #tpu.memory_space<vmem>>, vector<1x8xi32>
    %36 = vector.broadcast %34 : vector<6x1xi32> to vector<6x8xi32>
    %37 = vector.broadcast %35 : vector<1x8xi32> to vector<6x8xi32>
    %38 = arith.cmpi eq, %36, %37 : vector<6x8xi32>
    %c0_30 = arith.constant 0 : index
    %c0_31 = arith.constant 0 : index
    %39 = vector.load %arg8[%c0_30, %c0_31] : memref<8x1xi32, #tpu.memory_space<vmem>>, vector<8x1xi32>
    %c0_32 = arith.constant 0 : index
    %c0_33 = arith.constant 0 : index
    %40 = vector.load %arg9[%c0_32, %c0_33] : memref<1x6xi32, #tpu.memory_space<vmem>>, vector<1x6xi32>
    %41 = vector.broadcast %39 : vector<8x1xi32> to vector<8x6xi32>
    %42 = vector.broadcast %40 : vector<1x6xi32> to vector<8x6xi32>
    %43 = arith.cmpi eq, %41, %42 : vector<8x6xi32>
    %c0_34 = arith.constant 0 : index
    %c0_35 = arith.constant 0 : index
    %44 = vector.load %arg12[%c0_34, %c0_35] : memref<4x1xi32, #tpu.memory_space<vmem>>, vector<4x1xi32>
    %c0_36 = arith.constant 0 : index
    %c0_37 = arith.constant 0 : index
    %45 = vector.load %arg7[%c0_36, %c0_37] : memref<1x8xi32, #tpu.memory_space<vmem>>, vector<1x8xi32>
    %46 = vector.broadcast %44 : vector<4x1xi32> to vector<4x8xi32>
    %47 = vector.broadcast %45 : vector<1x8xi32> to vector<4x8xi32>
    %48 = arith.cmpi eq, %46, %47 : vector<4x8xi32>
    %c0_38 = arith.constant 0 : index
    %c0_39 = arith.constant 0 : index
    %49 = vector.load %arg8[%c0_38, %c0_39] : memref<8x1xi32, #tpu.memory_space<vmem>>, vector<8x1xi32>
    %c0_40 = arith.constant 0 : index
    %c0_41 = arith.constant 0 : index
    %50 = vector.load %arg11[%c0_40, %c0_41] : memref<1x4xi32, #tpu.memory_space<vmem>>, vector<1x4xi32>
    %51 = vector.broadcast %49 : vector<8x1xi32> to vector<8x4xi32>
    %52 = vector.broadcast %50 : vector<1x4xi32> to vector<8x4xi32>
    %53 = arith.cmpi eq, %51, %52 : vector<8x4xi32>
    %54 = vector.extract_strided_slice %31 {offsets = [0, 0], sizes = [8, 128], strides = [1, 1]} : vector<8x384xf32> to vector<8x128xf32>
    %55 = vector.extract_strided_slice %32 {offsets = [0, 128], sizes = [6, 1], strides = [1, 1]} : vector<6x256xf32> to vector<6x1xf32>
    %56 = vector.extract_strided_slice %28 {offsets = [0, 0], sizes = [1, 128], strides = [1, 1]} : vector<4x128xf32> to vector<1x128xf32>
    %cst_42 = arith.constant dense<0.000000e+00> : vector<1x8xf32>
    %57 = tpu.matmul %56, %54, %cst_42 {dimension_numbers = #tpu.dot_dimension_numbers<[1], [1], [0], [0], [0, 0, 1, 0], [], []>} : vector<1x128xf32>, vector<8x128xf32>, vector<1x8xf32> -> vector<1x8xf32>
    %58 = vector.broadcast %55 : vector<6x1xf32> to vector<6x8xf32>
    %59 = vector.broadcast %57 : vector<1x8xf32> to vector<6x8xf32>
    %60 = arith.addf %58, %59 : vector<6x8xf32>
    %cst_43 = arith.constant 0.000000e+00 : f32
    %61 = vector.broadcast %cst_43 : f32 to vector<6x8xf32>
    %62 = arith.cmpf ogt, %60, %61 : vector<6x8xf32>
    %cst_44 = arith.constant 2.000000e-01 : f32
    %63 = vector.broadcast %cst_44 : f32 to vector<6x8xf32>
    %64 = arith.mulf %63, %60 : vector<6x8xf32>
    %65 = arith.select %62, %60, %64 : vector<6x8xi1>, vector<6x8xf32>
    %cst_45 = arith.constant -1.000000e+30 : f32
    %66 = vector.broadcast %cst_45 : f32 to vector<6x8xf32>
    %67 = arith.select %38, %65, %66 : vector<6x8xi1>, vector<6x8xf32>
    %cst_46 = arith.constant dense<0xFF800000> : vector<6xf32>
    %68 = vector.multi_reduction <maximumf>, %67, %cst_46 [1] : vector<6x8xf32> to vector<6xf32>
    %69 = vector.shape_cast %68 : vector<6xf32> to vector<6x1xf32>
    %70 = vector.broadcast %69 : vector<6x1xf32> to vector<6x8xf32>
    %71 = arith.subf %67, %70 : vector<6x8xf32>
    %72 = math.exp %71 : vector<6x8xf32>
    %cst_47 = arith.constant 0.000000e+00 : f32
    %73 = vector.broadcast %cst_47 : f32 to vector<6x8xf32>
    %74 = arith.select %38, %72, %73 : vector<6x8xi1>, vector<6x8xf32>
    %cst_48 = arith.constant dense<0.000000e+00> : vector<6xf32>
    %75 = vector.multi_reduction <add>, %74, %cst_48 [1] : vector<6x8xf32> to vector<6xf32>
    %76 = vector.shape_cast %75 : vector<6xf32> to vector<6x1xf32>
    %cst_49 = arith.constant 1.000000e-16 : f32
    %77 = vector.broadcast %cst_49 : f32 to vector<6x1xf32>
    %78 = arith.addf %76, %77 : vector<6x1xf32>
    %79 = tpu.reciprocal %78 {approx = true} : vector<6x1xf32> -> vector<6x1xf32>
    %80 = vector.broadcast %79 : vector<6x1xf32> to vector<6x8xf32>
    %81 = arith.mulf %74, %80 : vector<6x8xf32>
    %82 = arith.truncf %81 : vector<6x8xf32> to vector<6x8xbf16>
    %83 = arith.truncf %54 : vector<8x128xf32> to vector<8x128xbf16>
    %cst_50 = arith.constant dense<0.000000e+00> : vector<6x128xf32>
    %84 = tpu.matmul %82, %83, %cst_50 {dimension_numbers = #tpu.dot_dimension_numbers<[1], [0], [0], [1], [0, 0, 1, 1], [], []>} : vector<6x8xbf16>, vector<8x128xbf16>, vector<6x128xf32> -> vector<6x128xf32>
    %85 = vector.extract_strided_slice %30 {offsets = [0, 0], sizes = [1, 128], strides = [1, 1]} : vector<4x128xf32> to vector<1x128xf32>
    %86 = vector.broadcast %85 : vector<1x128xf32> to vector<6x128xf32>
    %87 = arith.addf %84, %86 : vector<6x128xf32>
    %88 = vector.extract_strided_slice %32 {offsets = [0, 0], sizes = [6, 128], strides = [1, 1]} : vector<6x256xf32> to vector<6x128xf32>
    %89 = vector.extract_strided_slice %31 {offsets = [0, 256], sizes = [8, 1], strides = [1, 1]} : vector<8x384xf32> to vector<8x1xf32>
    %90 = vector.extract_strided_slice %28 {offsets = [1, 0], sizes = [1, 128], strides = [1, 1]} : vector<4x128xf32> to vector<1x128xf32>
    %cst_51 = arith.constant dense<0.000000e+00> : vector<1x6xf32>
    %91 = tpu.matmul %90, %88, %cst_51 {dimension_numbers = #tpu.dot_dimension_numbers<[1], [1], [0], [0], [0, 0, 1, 0], [], []>} : vector<1x128xf32>, vector<6x128xf32>, vector<1x6xf32> -> vector<1x6xf32>
    %92 = vector.broadcast %89 : vector<8x1xf32> to vector<8x6xf32>
    %93 = vector.broadcast %91 : vector<1x6xf32> to vector<8x6xf32>
    %94 = arith.addf %92, %93 : vector<8x6xf32>
    %cst_52 = arith.constant 0.000000e+00 : f32
    %95 = vector.broadcast %cst_52 : f32 to vector<8x6xf32>
    %96 = arith.cmpf ogt, %94, %95 : vector<8x6xf32>
    %cst_53 = arith.constant 2.000000e-01 : f32
    %97 = vector.broadcast %cst_53 : f32 to vector<8x6xf32>
    %98 = arith.mulf %97, %94 : vector<8x6xf32>
    %99 = arith.select %96, %94, %98 : vector<8x6xi1>, vector<8x6xf32>
    %cst_54 = arith.constant -1.000000e+30 : f32
    %100 = vector.broadcast %cst_54 : f32 to vector<8x6xf32>
    %101 = arith.select %43, %99, %100 : vector<8x6xi1>, vector<8x6xf32>
    %cst_55 = arith.constant dense<0xFF800000> : vector<8xf32>
    %102 = vector.multi_reduction <maximumf>, %101, %cst_55 [1] : vector<8x6xf32> to vector<8xf32>
    %103 = vector.shape_cast %102 : vector<8xf32> to vector<8x1xf32>
    %104 = vector.broadcast %103 : vector<8x1xf32> to vector<8x6xf32>
    %105 = arith.subf %101, %104 : vector<8x6xf32>
    %106 = math.exp %105 : vector<8x6xf32>
    %cst_56 = arith.constant 0.000000e+00 : f32
    %107 = vector.broadcast %cst_56 : f32 to vector<8x6xf32>
    %108 = arith.select %43, %106, %107 : vector<8x6xi1>, vector<8x6xf32>
    %cst_57 = arith.constant dense<0.000000e+00> : vector<8xf32>
    %109 = vector.multi_reduction <add>, %108, %cst_57 [1] : vector<8x6xf32> to vector<8xf32>
    %110 = vector.shape_cast %109 : vector<8xf32> to vector<8x1xf32>
    %cst_58 = arith.constant 1.000000e-16 : f32
    %111 = vector.broadcast %cst_58 : f32 to vector<8x1xf32>
    %112 = arith.addf %110, %111 : vector<8x1xf32>
    %113 = tpu.reciprocal %112 {approx = true} : vector<8x1xf32> -> vector<8x1xf32>
    %114 = vector.broadcast %113 : vector<8x1xf32> to vector<8x6xf32>
    %115 = arith.mulf %108, %114 : vector<8x6xf32>
    %116 = arith.truncf %115 : vector<8x6xf32> to vector<8x6xbf16>
    %117 = arith.truncf %88 : vector<6x128xf32> to vector<6x128xbf16>
    %cst_59 = arith.constant dense<0.000000e+00> : vector<8x128xf32>
    %118 = tpu.matmul %116, %117, %cst_59 {dimension_numbers = #tpu.dot_dimension_numbers<[1], [0], [0], [1], [0, 0, 1, 1], [], []>} : vector<8x6xbf16>, vector<6x128xbf16>, vector<8x128xf32> -> vector<8x128xf32>
    %119 = vector.extract_strided_slice %30 {offsets = [1, 0], sizes = [1, 128], strides = [1, 1]} : vector<4x128xf32> to vector<1x128xf32>
    %120 = vector.broadcast %119 : vector<1x128xf32> to vector<8x128xf32>
    %121 = arith.addf %118, %120 : vector<8x128xf32>
    %122 = vector.extract_strided_slice %33 {offsets = [0, 0], sizes = [4, 128], strides = [1, 1]} : vector<4x256xf32> to vector<4x128xf32>
    %123 = vector.extract_strided_slice %31 {offsets = [0, 257], sizes = [8, 1], strides = [1, 1]} : vector<8x384xf32> to vector<8x1xf32>
    %124 = vector.extract_strided_slice %28 {offsets = [3, 0], sizes = [1, 128], strides = [1, 1]} : vector<4x128xf32> to vector<1x128xf32>
    %cst_60 = arith.constant dense<0.000000e+00> : vector<1x4xf32>
    %125 = tpu.matmul %124, %122, %cst_60 {dimension_numbers = #tpu.dot_dimension_numbers<[1], [1], [0], [0], [0, 0, 1, 0], [], []>} : vector<1x128xf32>, vector<4x128xf32>, vector<1x4xf32> -> vector<1x4xf32>
    %126 = vector.broadcast %123 : vector<8x1xf32> to vector<8x4xf32>
    %127 = vector.broadcast %125 : vector<1x4xf32> to vector<8x4xf32>
    %128 = arith.addf %126, %127 : vector<8x4xf32>
    %cst_61 = arith.constant 0.000000e+00 : f32
    %129 = vector.broadcast %cst_61 : f32 to vector<8x4xf32>
    %130 = arith.cmpf ogt, %128, %129 : vector<8x4xf32>
    %cst_62 = arith.constant 2.000000e-01 : f32
    %131 = vector.broadcast %cst_62 : f32 to vector<8x4xf32>
    %132 = arith.mulf %131, %128 : vector<8x4xf32>
    %133 = arith.select %130, %128, %132 : vector<8x4xi1>, vector<8x4xf32>
    %cst_63 = arith.constant -1.000000e+30 : f32
    %134 = vector.broadcast %cst_63 : f32 to vector<8x4xf32>
    %135 = arith.select %53, %133, %134 : vector<8x4xi1>, vector<8x4xf32>
    %cst_64 = arith.constant dense<0xFF800000> : vector<8xf32>
    %136 = vector.multi_reduction <maximumf>, %135, %cst_64 [1] : vector<8x4xf32> to vector<8xf32>
    %137 = vector.shape_cast %136 : vector<8xf32> to vector<8x1xf32>
    %138 = vector.broadcast %137 : vector<8x1xf32> to vector<8x4xf32>
    %139 = arith.subf %135, %138 : vector<8x4xf32>
    %140 = math.exp %139 : vector<8x4xf32>
    %cst_65 = arith.constant 0.000000e+00 : f32
    %141 = vector.broadcast %cst_65 : f32 to vector<8x4xf32>
    %142 = arith.select %53, %140, %141 : vector<8x4xi1>, vector<8x4xf32>
    %cst_66 = arith.constant dense<0.000000e+00> : vector<8xf32>
    %143 = vector.multi_reduction <add>, %142, %cst_66 [1] : vector<8x4xf32> to vector<8xf32>
    %144 = vector.shape_cast %143 : vector<8xf32> to vector<8x1xf32>
    %cst_67 = arith.constant 1.000000e-16 : f32
    %145 = vector.broadcast %cst_67 : f32 to vector<8x1xf32>
    %146 = arith.addf %144, %145 : vector<8x1xf32>
    %147 = tpu.reciprocal %146 {approx = true} : vector<8x1xf32> -> vector<8x1xf32>
    %148 = vector.broadcast %147 : vector<8x1xf32> to vector<8x4xf32>
    %149 = arith.mulf %142, %148 : vector<8x4xf32>
    %150 = arith.truncf %149 : vector<8x4xf32> to vector<8x4xbf16>
    %151 = arith.truncf %122 : vector<4x128xf32> to vector<4x128xbf16>
    %cst_68 = arith.constant dense<0.000000e+00> : vector<8x128xf32>
    %152 = tpu.matmul %150, %151, %cst_68 {dimension_numbers = #tpu.dot_dimension_numbers<[1], [0], [0], [1], [0, 0, 1, 1], [], []>} : vector<8x4xbf16>, vector<4x128xbf16>, vector<8x128xf32> -> vector<8x128xf32>
    %153 = vector.extract_strided_slice %30 {offsets = [3, 0], sizes = [1, 128], strides = [1, 1]} : vector<4x128xf32> to vector<1x128xf32>
    %154 = vector.broadcast %153 : vector<1x128xf32> to vector<8x128xf32>
    %155 = arith.addf %152, %154 : vector<8x128xf32>
    %156 = arith.addf %121, %155 : vector<8x128xf32>
    %157 = vector.extract_strided_slice %31 {offsets = [0, 128], sizes = [8, 128], strides = [1, 1]} : vector<8x384xf32> to vector<8x128xf32>
    %158 = vector.extract_strided_slice %33 {offsets = [0, 128], sizes = [4, 1], strides = [1, 1]} : vector<4x256xf32> to vector<4x1xf32>
    %159 = vector.extract_strided_slice %28 {offsets = [2, 0], sizes = [1, 128], strides = [1, 1]} : vector<4x128xf32> to vector<1x128xf32>
    %cst_69 = arith.constant dense<0.000000e+00> : vector<1x8xf32>
    %160 = tpu.matmul %159, %157, %cst_69 {dimension_numbers = #tpu.dot_dimension_numbers<[1], [1], [0], [0], [0, 0, 1, 0], [], []>} : vector<1x128xf32>, vector<8x128xf32>, vector<1x8xf32> -> vector<1x8xf32>
    %161 = vector.broadcast %158 : vector<4x1xf32> to vector<4x8xf32>
    %162 = vector.broadcast %160 : vector<1x8xf32> to vector<4x8xf32>
    %163 = arith.addf %161, %162 : vector<4x8xf32>
    %cst_70 = arith.constant 0.000000e+00 : f32
    %164 = vector.broadcast %cst_70 : f32 to vector<4x8xf32>
    %165 = arith.cmpf ogt, %163, %164 : vector<4x8xf32>
    %cst_71 = arith.constant 2.000000e-01 : f32
    %166 = vector.broadcast %cst_71 : f32 to vector<4x8xf32>
    %167 = arith.mulf %166, %163 : vector<4x8xf32>
    %168 = arith.select %165, %163, %167 : vector<4x8xi1>, vector<4x8xf32>
    %cst_72 = arith.constant -1.000000e+30 : f32
    %169 = vector.broadcast %cst_72 : f32 to vector<4x8xf32>
    %170 = arith.select %48, %168, %169 : vector<4x8xi1>, vector<4x8xf32>
    %cst_73 = arith.constant dense<0xFF800000> : vector<4xf32>
    %171 = vector.multi_reduction <maximumf>, %170, %cst_73 [1] : vector<4x8xf32> to vector<4xf32>
    %172 = vector.shape_cast %171 : vector<4xf32> to vector<4x1xf32>
    %173 = vector.broadcast %172 : vector<4x1xf32> to vector<4x8xf32>
    %174 = arith.subf %170, %173 : vector<4x8xf32>
    %175 = math.exp %174 : vector<4x8xf32>
    %cst_74 = arith.constant 0.000000e+00 : f32
    %176 = vector.broadcast %cst_74 : f32 to vector<4x8xf32>
    %177 = arith.select %48, %175, %176 : vector<4x8xi1>, vector<4x8xf32>
    %cst_75 = arith.constant dense<0.000000e+00> : vector<4xf32>
    %178 = vector.multi_reduction <add>, %177, %cst_75 [1] : vector<4x8xf32> to vector<4xf32>
    %179 = vector.shape_cast %178 : vector<4xf32> to vector<4x1xf32>
    %cst_76 = arith.constant 1.000000e-16 : f32
    %180 = vector.broadcast %cst_76 : f32 to vector<4x1xf32>
    %181 = arith.addf %179, %180 : vector<4x1xf32>
    %182 = tpu.reciprocal %181 {approx = true} : vector<4x1xf32> -> vector<4x1xf32>
    %183 = vector.broadcast %182 : vector<4x1xf32> to vector<4x8xf32>
    %184 = arith.mulf %177, %183 : vector<4x8xf32>
    %185 = arith.truncf %184 : vector<4x8xf32> to vector<4x8xbf16>
    %186 = arith.truncf %157 : vector<8x128xf32> to vector<8x128xbf16>
    %cst_77 = arith.constant dense<0.000000e+00> : vector<4x128xf32>
    %187 = tpu.matmul %185, %186, %cst_77 {dimension_numbers = #tpu.dot_dimension_numbers<[1], [0], [0], [1], [0, 0, 1, 1], [], []>} : vector<4x8xbf16>, vector<8x128xbf16>, vector<4x128xf32> -> vector<4x128xf32>
    %188 = vector.extract_strided_slice %30 {offsets = [2, 0], sizes = [1, 128], strides = [1, 1]} : vector<4x128xf32> to vector<1x128xf32>
    %189 = vector.broadcast %188 : vector<1x128xf32> to vector<4x128xf32>
    %190 = arith.addf %187, %189 : vector<4x128xf32>
    %c0_78 = arith.constant 0 : index
    %c0_79 = arith.constant 0 : index
    %191 = vector.load %arg22[%c0_78, %c0_79] : memref<8x128xf32, #tpu.memory_space<vmem>>, vector<8x128xf32>
    tpu.vector_store %arg22[%c0_78, %c0_79], %156 {strides = array<i32>} : memref<8x128xf32, #tpu.memory_space<vmem>>, vector<8x128xf32>,
    %c0_80 = arith.constant 0 : index
    %c0_81 = arith.constant 0 : index
    %192 = vector.load %arg23[%c0_80, %c0_81] : memref<6x128xf32, #tpu.memory_space<vmem>>, vector<6x128xf32>
    tpu.vector_store %arg23[%c0_80, %c0_81], %87 {strides = array<i32>} : memref<6x128xf32, #tpu.memory_space<vmem>>, vector<6x128xf32>,
    %c0_82 = arith.constant 0 : index
    %c0_83 = arith.constant 0 : index
    %193 = vector.load %arg24[%c0_82, %c0_83] : memref<4x128xf32, #tpu.memory_space<vmem>>, vector<4x128xf32>
    tpu.vector_store %arg24[%c0_82, %c0_83], %190 {strides = array<i32>} : memref<4x128xf32, #tpu.memory_space<vmem>>, vector<4x128xf32>,
    %c3_i32_84 = arith.constant 3 : i32
    %194 = arith.cmpi eq, %arg0, %c3_i32_84 : i32
    %195 = arith.extui %194 : i1 to i32
    %c0_i32_85 = arith.constant 0 : i32
    %196 = arith.cmpi ne, %195, %c0_i32_85 : i32
    scf.if %196 {
      %c0_87 = arith.constant 0 : index
      %c0_88 = arith.constant 0 : index
      %200 = vector.load %arg18[%c0_87, %c0_88] : memref<8x128xf32, #tpu.memory_space<vmem>>, vector<8x128xf32>
      tpu.vector_store %arg18[%c0_87, %c0_88], %156 {strides = array<i32>} : memref<8x128xf32, #tpu.memory_space<vmem>>, vector<8x128xf32>,
      %c0_89 = arith.constant 0 : index
      %c0_90 = arith.constant 0 : index
      %201 = vector.load %arg19[%c0_89, %c0_90] : memref<6x128xf32, #tpu.memory_space<vmem>>, vector<6x128xf32>
      tpu.vector_store %arg19[%c0_89, %c0_90], %87 {strides = array<i32>} : memref<6x128xf32, #tpu.memory_space<vmem>>, vector<6x128xf32>,
      %c0_91 = arith.constant 0 : index
      %c0_92 = arith.constant 0 : index
      %202 = vector.load %arg20[%c0_91, %c0_92] : memref<4x128xf32, #tpu.memory_space<vmem>>, vector<4x128xf32>
      tpu.vector_store %arg20[%c0_91, %c0_92], %190 {strides = array<i32>} : memref<4x128xf32, #tpu.memory_space<vmem>>, vector<4x128xf32>,
    } else {
    }
    %c4_i32 = arith.constant 4 : i32
    %197 = arith.cmpi eq, %arg0, %c4_i32 : i32
    %198 = arith.extui %197 : i1 to i32
    %c0_i32_86 = arith.constant 0 : i32
    %199 = arith.cmpi ne, %198, %c0_i32_86 : i32
    scf.if %199 {
      %c0_87 = arith.constant 0 : index
      %c0_88 = arith.constant 0 : index
      %200 = vector.load %arg21[%c0_87, %c0_88] : memref<8x128xf32, #tpu.memory_space<vmem>>, vector<8x128xf32>
      tpu.vector_store %arg21[%c0_87, %c0_88], %156 {strides = array<i32>} : memref<8x128xf32, #tpu.memory_space<vmem>>, vector<8x128xf32>,
    } else {
    }
    return
  }
  func.func @transform_0(%arg0: i32) -> (i32, i32) {
    %c0_i32 = arith.constant 0 : i32
    %c0_i32_0 = arith.constant 0 : i32
    %c0_i32_1 = arith.constant 0 : i32
    return %c0_i32, %c0_i32_0 : i32, i32
  }
  func.func @transform_1(%arg0: i32) -> (i32, i32) {
    %c0_i32 = arith.constant 0 : i32
    %c0_i32_0 = arith.constant 0 : i32
    %c0_i32_1 = arith.constant 0 : i32
    return %c0_i32, %c0_i32_0 : i32, i32
  }
  func.func @transform_2(%arg0: i32) -> (i32, i32) {
    %c0_i32 = arith.constant 0 : i32
    %c0_i32_0 = arith.constant 0 : i32
    %c0_i32_1 = arith.constant 0 : i32
    return %c0_i32, %c0_i32_0 : i32, i32
  }
  func.func @transform_3(%arg0: i32) -> (i32, i32) {
    %c0_i32 = arith.constant 0 : i32
    %c0_i32_0 = arith.constant 0 : i32
    %c0_i32_1 = arith.constant 0 : i32
    return %c0_i32, %c0_i32_0 : i32, i32
  }
  func.func @transform_4(%arg0: i32) -> (i32, i32) {
    %c0_i32 = arith.constant 0 : i32
    %c0_i32_0 = arith.constant 0 : i32
    %c0_i32_1 = arith.constant 0 : i32
    return %c0_i32, %c0_i32_0 : i32, i32
  }
  func.func @transform_5(%arg0: i32) -> (i32, i32) {
    %c0_i32 = arith.constant 0 : i32
    %c0_i32_0 = arith.constant 0 : i32
    %c0_i32_1 = arith.constant 0 : i32
    return %c0_i32, %c0_i32_0 : i32, i32
  }
  func.func @transform_6(%arg0: i32) -> (i32, i32) {
    %c0_i32 = arith.constant 0 : i32
    %c0_i32_0 = arith.constant 0 : i32
    %c0_i32_1 = arith.constant 0 : i32
    return %c0_i32, %c0_i32_0 : i32, i32
  }
  func.func @transform_7(%arg0: i32) -> (i32, i32) {
    %c0_i32 = arith.constant 0 : i32
    %c0_i32_0 = arith.constant 0 : i32
    %c0_i32_1 = arith.constant 0 : i32
    return %c0_i32, %c0_i32_0 : i32, i32
  }
  func.func @transform_8(%arg0: i32) -> (i32, i32) {
    %c0_i32 = arith.constant 0 : i32
    %c0_i32_0 = arith.constant 0 : i32
    %c0_i32_1 = arith.constant 0 : i32
    return %c0_i32, %c0_i32_0 : i32, i32
  }
  func.func @transform_9(%arg0: i32) -> (i32, i32) {
    %c0_i32 = arith.constant 0 : i32
    %c0_i32_0 = arith.constant 0 : i32
    %c0_i32_1 = arith.constant 0 : i32
    return %c0_i32, %c0_i32_0 : i32, i32
  }
  func.func @transform_10(%arg0: i32) -> (i32, i32) {
    %c0_i32 = arith.constant 0 : i32
    %c0_i32_0 = arith.constant 0 : i32
    %c0_i32_1 = arith.constant 0 : i32
    return %c0_i32, %c0_i32_0 : i32, i32
  }
  func.func @transform_11(%arg0: i32) -> (i32, i32) {
    %c0_i32 = arith.constant 0 : i32
    %c0_i32_0 = arith.constant 0 : i32
    %c0_i32_1 = arith.constant 0 : i32
    return %c0_i32, %c0_i32_0 : i32, i32
  }
  func.func @transform_12(%arg0: i32) -> (i32, i32, i32) {
    %c0_i32 = arith.constant 0 : i32
    %c0_i32_0 = arith.constant 0 : i32
    %c0_i32_1 = arith.constant 0 : i32
    return %arg0, %c0_i32, %c0_i32_0 : i32, i32, i32
  }
  func.func @transform_13(%arg0: i32) -> (i32, i32, i32) {
    %c0_i32 = arith.constant 0 : i32
    %c0_i32_0 = arith.constant 0 : i32
    %c0_i32_1 = arith.constant 0 : i32
    return %arg0, %c0_i32, %c0_i32_0 : i32, i32, i32
  }
  func.func @transform_14(%arg0: i32) -> (i32, i32, i32) {
    %c0_i32 = arith.constant 0 : i32
    %c0_i32_0 = arith.constant 0 : i32
    %c0_i32_1 = arith.constant 0 : i32
    return %arg0, %c0_i32, %c0_i32_0 : i32, i32, i32
  }
  func.func @transform_15(%arg0: i32) -> (i32, i32, i32) {
    %c0_i32 = arith.constant 0 : i32
    %c0_i32_0 = arith.constant 0 : i32
    %c0_i32_1 = arith.constant 0 : i32
    return %arg0, %c0_i32, %c0_i32_0 : i32, i32, i32
  }
  func.func @transform_16(%arg0: i32) -> (i32, i32, i32) {
    %c0_i32 = arith.constant 0 : i32
    %c0_i32_0 = arith.constant 0 : i32
    %c0_i32_1 = arith.constant 0 : i32
    return %arg0, %c0_i32, %c0_i32_0 : i32, i32, i32
  }
  func.func @transform_17(%arg0: i32) -> (i32, i32) {
    %c0_i32 = arith.constant 0 : i32
    %c0_i32_0 = arith.constant 0 : i32
    %c0_i32_1 = arith.constant 0 : i32
    return %c0_i32, %c0_i32_0 : i32, i32
  }
  func.func @transform_18(%arg0: i32) -> (i32, i32) {
    %c0_i32 = arith.constant 0 : i32
    %c0_i32_0 = arith.constant 0 : i32
    %c0_i32_1 = arith.constant 0 : i32
    return %c0_i32, %c0_i32_0 : i32, i32
  }
  func.func @transform_19(%arg0: i32) -> (i32, i32) {
    %c0_i32 = arith.constant 0 : i32
    %c0_i32_0 = arith.constant 0 : i32
    %c0_i32_1 = arith.constant 0 : i32
    return %c0_i32, %c0_i32_0 : i32, i32
  }
  func.func @transform_20(%arg0: i32) -> (i32, i32) {
    %c0_i32 = arith.constant 0 : i32
    %c0_i32_0 = arith.constant 0 : i32
    %c0_i32_1 = arith.constant 0 : i32
    return %c0_i32, %c0_i32_0 : i32, i32
  }
}

</mosaic_0001>

<bundles_post_ra>
// kernel: tpu_custom_call.1
= control target key start
LH: loop header
LB: loop body
LE: loop exit
PB: predicated region body
PF: predicated region fallthrough
CT: control target
= control target key end

     0   :  { %s3525_s0 = inlined_call_operand.vmem [shape: f32[8,1], index: 0, kind: input, shape index: {}]   ;;  %s3526_s1 = inlined_call_operand.vmem [shape: f32[8,4], index: 1, kind: input, shape index: {}]   ;;  %s3527_s2 = inlined_call_operand.vmem [shape: f32[1,128], index: 2, kind: input, shape index: {}]   ;;  %s3528_s3 = inlined_call_operand.hbm [shape: f32[4,128], index: 3, kind: input, shape index: {}]   ;;  %s3529_s4 = inlined_call_operand.vmem [shape: f32[6,128], index: 4, kind: input, shape index: {}]   ;;  %s3530_s5 = inlined_call_operand.vmem [shape: f32[4,128], index: 5, kind: input, shape index: {}]   ;;  %s3531_s6 = inlined_call_operand.vmem [shape: s32[1,8], index: 6, kind: input, shape index: {}]   ;;  %s3532_s7 = inlined_call_operand.vmem [shape: s32[8,1], index: 7, kind: input, shape index: {}]   ;;  %s3533_s8 = inlined_call_operand.vmem [shape: s32[1,6], index: 8, kind: input, shape index: {}]   ;;  %s3534_s9 = inlined_call_operand.vmem [shape: s32[6,1], index: 9, kind: input, shape index: {}]   ;;  %s3535_s10 = inlined_call_operand.vmem [shape: s32[1,4], index: 10, kind: input, shape index: {}]   ;;  %s3536_s11 = inlined_call_operand.vmem [shape: s32[4,1], index: 11, kind: input, shape index: {}]   ;;  %s3537_s12 = inlined_call_operand.hbm [shape: bf16[5,128,384], index: 12, kind: input, shape index: {}]   ;;  %s3538_s13 = inlined_call_operand.hbm [shape: bf16[5,128,256], index: 13, kind: input, shape index: {}]   ;;  %s3539_s14 = inlined_call_operand.hbm [shape: bf16[5,128,256], index: 14, kind: input, shape index: {}]   ;;  %s3540_s15 = inlined_call_operand.vmem [shape: f32[5,4,128], index: 15, kind: input, shape index: {}]   ;;  %s3541_s16 = inlined_call_operand.vmem [shape: f32[5,4,128], index: 16, kind: input, shape index: {}]   ;;  %s3542_s17 = inlined_call_operand.hbm [shape: f32[8,128], index: 17, kind: output, shape index: {0}]   ;;  %s3543_s18 = inlined_call_operand.hbm [shape: f32[6,128], index: 18, kind: output, shape index: {1}]   ;;  %s3544_s19 = inlined_call_operand.hbm [shape: f32[4,128], index: 19, kind: output, shape index: {2}]   ;;  %s3545_s20 = inlined_call_operand.hbm [shape: f32[8,128], index: 20, kind: output, shape index: {3}]  }
   0x1   :  { %3554 = sst [smem:[#allocation28_spill]] %s3525_s0 }
   0x2   :  { %3555 = sst [smem:[#allocation29_spill]] %s3526_s1 }
   0x3   :  { %3556 = sst [smem:[#allocation30_spill]] %s3527_s2 }
   0x4   :  { %3557 = sst [smem:[#allocation31_spill]] %s3528_s3 }
   0x5   :  { %3558 = sst [smem:[#allocation32_spill]] %s3529_s4 }
   0x6   :  { %3559 = sst [smem:[#allocation33_spill]] %s3535_s10 }
   0x7   :  { %3560 = sst [smem:[#allocation34_spill]] %s3537_s12 }
   0x8   :  { %3561 = sst [smem:[#allocation35_spill]] %s3538_s13 }
   0x9   :  { %3562 = sst [smem:[#allocation36_spill]] %s3542_s17 }
   0xa   :  { %3563 = sst [smem:[#allocation37_spill]] %s3543_s18 }
   0xb   :  { %3564 = sst [smem:[#allocation38_spill]] %s3544_s19 }
   0xc   :  { %3565 = sst [smem:[#allocation39_spill]] %s3545_s20 }
   0xd   :  { %26 = vsyncpa [#allocation6], 0 }
   0xe   :  { %27 = vsyncpa [#allocation9], 0 }
   0xf   :  { %29 = vsyncpa [#allocation9 + $0x1], 0 }
  0x10   :  { %30 = vsyncpa [#allocation12], 0 }
  0x11   :  { %32 = vsyncpa [#allocation12 + $0x1], 0 }
  0x12   :  { %33 = vsyncpa [#allocation7], 0 }
  0x13   :  { %34 = vsyncpa [#allocation15], 0 }
  0x14   :  { %35 = vsyncpa [#allocation18], 0  ;;  %s3037_s1 = smov 0   ;;  %s3039_s22 = smov 0  }
  0x15   :  { %s3041_s23 = smov 0   ;;  %s3043_s24 = smov 0  }
  0x16 LB: > { %3566 = sst [smem:[#allocation25_spill]] %s2907_s23  ;;  %s3058_s2 = sadd.s32 1, %s2911_s24   ;;  %s2911_s24 = sphi %s3043_s24, %s3592_s24   ;;  %s2907_s23 = sphi %s3041_s23, %s3594_s23   ;;  %s2903_s22 = sphi %s3039_s22, %s3596_s22   ;;  %s2899_s1 = sphi %s3037_s1, %s3595_s1  }
  0x17   : > { %3567 = sst [smem:[#allocation26_spill]] %s3058_s2  ;;  %s300_s25 = sadd.s32 1, %s2907_s23 }
  0x18   : > { %s297_s3 = ssub.s32 %s2911_s24, %s3058_s2  ;;  %p307_p0 = scmp.ne.s32.totalorder %s2907_s23, %s2903_s22 }
  0x19   : > { %p298_p1 = scmp.eq.s32.totalorder %s297_s3, 0  ;;  %p308_p2 = scmp.eq.s32.totalorder %s2911_s24, 0 }
  0x1a   : > { %p2492_p3 = scmp.lt.s32.totalorder %s2911_s24, 5  ;;  %s569_s27 = sand.u32 1, %s2911_s24  }
  0x1b   : > { %s3068_s26 = scalar_select %p298_p1, %s2907_s23, %s300_s25  }
  0x1c   : > { %p309_p4 = por %p308_p2, %p307_p0  ;;  %s3072_s28 = sand.u32 1, %s2907_s23  }
  0x1d   : > { %3568 = sst [smem:[#allocation27_spill]] %s3068_s26  ;;  %s2448_s4 = smul.u32 192, %s3072_s28 }
  0x1e   : > { %p3075_p5 = pnand %p2492_p3, %p309_p4  ;;  %s2449_s30 = smul.u32 3072, %s2911_s24 }
  0x1f   : > { %s3570_s12 = sld [smem:[#allocation34_spill]]  ;;  %s573_s25 = scalar_lea.vmem [#allocation8], %s2448_s4 }
  0x20   : > { %s580_s26 = sshll.u32 %s573_s25, 4  ;;  %s3087_s23 = scalar_lea.sflag [#allocation9], %s569_s27  ;;  %s3085_s26 = int_to_ptr.vmem [resolvable:$true] %s580_s26 }
  0x21   : > { %p3093_p7 = pneg %p3075_p5 }
  0x25   : > { %s3083_s3 = scalar_lea.hbm %s3570_s12, %s2449_s30  ;;  %s2656_s4 = scalar_lea.hbm %s3570_s12, 15360 }
  0x26   : > { %s2651_s2 = scalar_lea.hbm %s3083_s3, 3072  ;;  %p2657_p10 = scmp.lt.s32.totalorder %s3083_s3, %s3570_s12 }
  0x27   : > { %p2652_p6 = scmp.ne.s32.totalorder %s3083_s3, %s2651_s2  ;;  %p2658_p11 = scmp.lt.s32.totalorder %s2656_s4, %s2651_s2 }
  0x29   : > { %p2654_p8 = pnand %p3093_p7, %p2652_p6  ;;  %p2659_p12 = por %p2658_p11, %p2657_p10 }
  0x2b   : > { %p2655_p9 = pneg %p2654_p8 }
  0x2d   : > { %p2660_p13 = pnand %p2659_p12, %p2655_p9 }
  0x2f   : > { %2663 = shalt.err (!%p2660_p13)
}
  0x30   : > { %s2664_s27 = scalar_lea.vmem %s3085_s26, 3072  ;;  %s2913_s19 = smov [#allocation8]  }
  0x31   : > { %p2665_p0 = scmp.ne.s32.totalorder %s3085_s26, %s2664_s27  ;;  %s2669_s30 = sshll.u32 %s2913_s19, 4  ;;  %s2670_s30 = int_to_ptr.vmem [resolvable:$false] %s2669_s30 }
  0x32   : > { %s2671_s0 = scalar_lea.vmem %s2670_s30, 6144  ;;  %p2672_p3 = scmp.lt.s32.totalorder %s3085_s26, %s2670_s30 }
  0x33   : > { %p2667_p1 = pnand %p2665_p0, %p3093_p7  ;;  %p2673_p4 = scmp.lt.s32.totalorder %s2671_s0, %s2664_s27 }
  0x35   : > { %p2668_p2 = pneg %p2667_p1  ;;  %p2674_p6 = por %p2673_p4, %p2672_p3 }
  0x37   : > { %p2675_p8 = pnand %p2674_p6, %p2668_p2 }
  0x39   : > { %2678 = shalt.err (!%p2675_p8)
}
  0x3a   : > { %s2914_s2 = smov 192   ;;  %s2915_s19 = smov 12  }
  0x3b   : > { %2484 = dma.hbm_to_vmem [thread:$0]  (!%p3075_p5), %s3083_s3, 3072, %s3085_s26, %s3087_s23, %s2914_s2, %s2914_s2, %s2915_s19  }
  0x3c   : > { %s3117_s4 = sadd.s32 4294967295, %s2911_s24   ;;  %p313_p10 = scmp.ne.s32.totalorder %s2903_s22, %s2899_s1 }
  0x3d   : > { %p3551_p9 = scmp.eq.s32.totalorder %s3117_s4, 0  ;;  %p2254_p11 = scmp.ge.s32.totalorder %s2911_s24, 1 }
  0x3e   : > { %p512_p12 = scmp.lt.s32.totalorder %s2911_s24, 6  ;;  %s2916_s26 = smov [#allocation5]  }
  0x3f   : > { %p3127_p0 = por %p3551_p9, %p313_p10  ;;  %s534_s3 = sshll.u32 %s2916_s26, 4  ;;  %s535_s3 = int_to_ptr.vmem [resolvable:$true] %s534_s3 }
  0x40   : > { %p3131_p1 = pnand %p2254_p11, %p512_p12  ;;  %s3550_s27 = sshll.u32 %s3072_s28, 7 }
  0x41   : > { %s3572_s21 = scalar_select %p3127_p0, 1, 0 }
  0x42   : > { %s3573_s25 = scalar_select %p3131_p1, 1, 0 }
  0x43   : > { %p2477_p2 = pneg %p3131_p1  ;;  %s3553_s1 = sshll.u32 %s2911_s24, 11 }
  0x44   : > { %s594_s30 = scalar_lea.vmem [#allocation10], %s3550_s27  ;;  %s3574_s13 = sld [smem:[#allocation35_spill]] }
  0x45   : > { %s601_s0 = sshll.u32 %s594_s30, 4  ;;  %p2478_p3 = pnand %p2477_p2, %p3551_p9  ;;  %s3150_s0 = int_to_ptr.vmem [resolvable:$true] %s601_s0 }
  0x46   : > { %s2690_s26 = scalar_lea.vmem %s535_s3, 64  ;;  %p2698_p11 = scmp.lt.s32.totalorder %s535_s3, %s535_s3 }
  0x47   : > { %p2681_p4 = pneg %p2478_p3  ;;  %p2691_p6 = scmp.ne.s32.totalorder %s535_s3, %s2690_s26 }
  0x48   : > { %p2699_p12 = scmp.lt.s32.totalorder %s2690_s26, %s2690_s26 }
  0x49   : > { %p2693_p8 = pnand %p2691_p6, %p2681_p4 }
  0x4a   : > { %s3148_s12 = scalar_lea.hbm %s3574_s13, %s3553_s1  ;;  %p2700_p13 = por %p2699_p12, %p2698_p11 }
  0x4b   : > { %p2694_p10 = pneg %p2693_p8 }
  0x4d   : > { %p2701_p0 = pnand %p2700_p13, %p2694_p10 }
  0x4f   : > { %2704 = shalt.err (!%p2701_p0)
}
  0x50   : > { %s3575_s17 = sld [smem:[#allocation31_spill]]  ;;  %s2705_s2 = scalar_lea.hbm %s3148_s12, 2048 }
  0x51   : > { %p2706_p2 = scmp.ne.s32.totalorder %s3148_s12, %s2705_s2  ;;  %s2710_s26 = scalar_lea.hbm %s3574_s13, 10240 }
  0x52   : > { %p2711_p13 = scmp.lt.s32.totalorder %s3148_s12, %s3574_s13  ;;  %p2712_p0 = scmp.lt.s32.totalorder %s2710_s26, %s2705_s2 }
  0x53   : > { %p2708_p9 = pnand %p2706_p2, %p3093_p7 }
  0x54   : > { %p2713_p4 = por %p2712_p0, %p2711_p13 }
  0x55   : > { %p2709_p1 = pneg %p2708_p9 }
  0x56   : > { %2480 = dma.hbm_to_vmem [thread:$0]  (!%p2478_p3), %s3575_s17, 64, %s535_s3, [#allocation6]  }
  0x57   : > { %p2714_p6 = pnand %p2713_p4, %p2709_p1 }
  0x59   : > { %2717 = shalt.err (!%p2714_p6)
}
  0x5a   : > { %s2718_s17 = scalar_lea.vmem %s3150_s0, 2048  ;;  %s2917_s3 = smov [#allocation10]  }
  0x5b   : > { %p2719_p3 = scmp.ne.s32.totalorder %s3150_s0, %s2718_s17  ;;  %s2723_s27 = sshll.u32 %s2917_s3, 4  ;;  %s2724_s27 = int_to_ptr.vmem [resolvable:$false] %s2723_s27 }
  0x5c   : > { %s2725_s1 = scalar_lea.vmem %s2724_s27, 4096  ;;  %p2726_p10 = scmp.lt.s32.totalorder %s3150_s0, %s2724_s27 }
  0x5d   : > { %p2721_p9 = pnand %p2719_p3, %p3093_p7  ;;  %p2727_p11 = scmp.lt.s32.totalorder %s2725_s1, %s2718_s17 }
  0x5f   : > { %p2722_p8 = pneg %p2721_p9  ;;  %p2728_p12 = por %p2727_p11, %p2726_p10 }
  0x61   : > { %p2729_p2 = pnand %p2728_p12, %p2722_p8 }
  0x63   : > { %2732 = shalt.err (!%p2729_p2)
}
  0x64   : > { %s2918_s10 = smov 128   ;;  %s2919_s18 = smov 8  }
  0x65   : > { %2487 = dma.hbm_to_vmem [thread:$0]  (!%p3075_p5), %s3148_s12, 2048, %s3150_s0, %s3087_s23, %s2918_s10, %s2918_s10, %s2919_s18  }
  0x66   : > { %s3576_s30 = sshll.u32 %s2911_s24, 11  ;;  %s3577_s17 = sshll.u32 %s3072_s28, 7 }
  0x67   : > { %s3184_s26 = scalar_lea.hbm %s3539_s14, %s3576_s30  ;;  %s615_s3 = scalar_lea.vmem [#allocation11], %s3577_s17 }
  0x68   : > { %s622_s27 = sshll.u32 %s615_s3, 4  ;;  %s612_s1 = scalar_lea.sflag [#allocation12], %s3072_s28  ;;  %s3188_s27 = int_to_ptr.vmem [resolvable:$true] %s622_s27 }
  0x69   : > { %s2733_s13 = scalar_lea.hbm %s3184_s26, 2048  ;;  %s2738_s24 = scalar_lea.hbm %s3539_s14, 10240 }
  0x6a   : > { %p2734_p1 = scmp.ne.s32.totalorder %s3184_s26, %s2733_s13  ;;  %p2739_p4 = scmp.lt.s32.totalorder %s3184_s26, %s3539_s14 }
  0x6b   : > { %p2740_p6 = scmp.lt.s32.totalorder %s2738_s24, %s2733_s13 }
  0x6c   : > { %p2736_p13 = pnand %p2734_p1, %p3093_p7 }
  0x6d   : > { %p2741_p3 = por %p2740_p6, %p2739_p4 }
  0x6e   : > { %p2737_p0 = pneg %p2736_p13 }
  0x70   : > { %p2742_p9 = pnand %p2741_p3, %p2737_p0 }
  0x72   : > { %2745 = shalt.err (!%p2742_p9)
}
  0x73   : > { %s2746_s28 = scalar_lea.vmem %s3188_s27, 2048  ;;  %s2920_s2 = smov [#allocation11]  }
  0x74   : > { %p2747_p8 = scmp.ne.s32.totalorder %s3188_s27, %s2746_s28  ;;  %s2751_s19 = sshll.u32 %s2920_s2, 4  ;;  %s2752_s19 = int_to_ptr.vmem [resolvable:$false] %s2751_s19 }
  0x75   : > { %s2753_s17 = scalar_lea.vmem %s2752_s19, 4096  ;;  %p2754_p12 = scmp.lt.s32.totalorder %s3188_s27, %s2752_s19 }
  0x76   : > { %p2749_p10 = pnand %p2747_p8, %p3093_p7  ;;  %p2755_p2 = scmp.lt.s32.totalorder %s2753_s17, %s2746_s28 }
  0x78   : > { %p2750_p11 = pneg %p2749_p10  ;;  %p2756_p1 = por %p2755_p2, %p2754_p12 }
  0x7a   : > { %p2757_p13 = pnand %p2756_p1, %p2750_p11 }
  0x7c   : > { %2760 = shalt.err (!%p2757_p13)
}
  0x7d   : > { %2490 = dma.hbm_to_vmem [thread:$0]  (!%p3075_p5), %s3184_s26, 2048, %s3188_s27, %s612_s1, %s2918_s10, %s2918_s10, %s2919_s18  }
  0x7e   : > { %p3578_p7 = scmp.ne.s32.totalorder %s3573_s25, 0 }
  0x7f   : > { %p3579_p0 = scmp.eq.s32.totalorder (!%p3578_p7), %s3117_s4, 0 }
  0x80   : > { %648 = sbr.rel (%p3578_p7) target bundleno = 1921 (0x781), region = 88 }
  0x85   : > { %2874 = dma.done.wait (%p3579_p0), [#allocation6], 64   ;;  %p3580_p4 = pmov %p3579_p0 }
  0x86   : > { %s654_s13 = sand.u32 1, %s3117_s4   ;;  %s656_s20 = sand.u32 1, %s2903_s22  }
  0x87   : > { %2876 = vsyncadd (%p3580_p4), [#allocation6], 4294967232  ;;  %s2450_s29 = smul.u32 192, %s656_s20  ;;  %s655_s3 = scalar_lea.sflag [#allocation9], %s654_s13 }
  0x88   : > { %p3581_p6 = scmp.ne.s32.totalorder %s3572_s21, 0 }
  0x89   : > { %s3222_s12 = scalar_lea.vmem [#allocation8], %s2450_s29 }
  0x8a   : > { %2878 = dma.done.wait (%p3581_p6), %s655_s3, 5120  }
  0x8b   : > { %2880 = vsyncadd (%p3581_p6), %s655_s3, 4294962176  ;;  %s2266_s25 = sshll.u32 %s656_s20, 7  ;;  %s673_s18 = scalar_lea.sflag [#allocation12], %s656_s20 }
  0x8c   : > { %s3228_s10 = scalar_lea.vmem [#allocation10], %s2266_s25  ;;  %s3230_s26 = scalar_lea.vmem [#allocation11], %s2266_s25 }
  0x8d   : > { %2882 = dma.done.wait (%p3581_p6), %s673_s18, 2048  }
  0x8e   : > { %2884 = vsyncadd (%p3581_p6), %s673_s18, 4294965248  ;;  %p746_p5 = scmp.lt.s32.totalorder %s3117_s4, 4  ;;  %p3582_p3 = scmp.ne.s32.totalorder %s3117_s4, 0 }
  0x8f   : > { %s3583_s17 = sld [smem:[#allocation29_spill]] (!%p3582_p3) }
  0x90   : > { %s747_s27 = scalar_select %p746_p5, %s3117_s4, 4 }
  0x91   : > { %758 = sbr.rel (%p3582_p3) target bundleno = 349 (0x15d), region = 108  ;;  %s3584_s29 = sld [smem:[#allocation28_spill]] (!%p3582_p3) }
  0x92   : > { %s2268_s1 = sshll.u32 %s747_s27, 2  ;;  %s3585_s18 = sld [smem:[#allocation32_spill]] (!%p3582_p3) }
  0x93   : > { %s3241_s0 = scalar_lea.vmem %s3540_s15, %s2268_s1  ;;  %s3246_s2 = scalar_lea.vmem %s3541_s16, %s2268_s1 }
  0x94   : > { %s3586_s30 = sld [smem:[#allocation30_spill]] (!%p3582_p3) }
  0x96   : > { %v774_v0 = vld [vmem:[#allocation5] sm:$0xf]  ;;  %vm779_vm0 = vcmask 1043456   ;;  %v773_v1 = vld [vmem:[%s3583_s17] sm:$0xff]  ;;  %v2921_v2 = vmov 0.0   ;;  %vm2922_vm1 = vmmov 0  }
  0x97   : > { %2379 = vmatprep.subr.mxu0 %v2921_v2  ;;  %2381 = vmatprep.mubr.msk.f32.mxu0 %vm2922_vm1, %v2921_v2  ;;  %vm775_vm2 = vcmask 31744   ;;  %v759_v3 = vld [vmem:[%s3584_s29] sm:$0xff]  ;;  %v2923_v4 = vmov 0  }
  0x98   : > { %2380 = vmatpush3.msk.msra.mxu0 %vm779_vm0, %v774_v0  ;;  %2550 = vset.pattern.permute.xlu0 %v2923_v4  ;;  %v855_v5 = vld [vmem:[%s3585_s18] sm:$0x3f] }
  0x99   : > { %2382 = vmatmul.mubr.msk.f32.vlgmr.msra.gmra.mxu0 %vm775_vm2, %v773_v1  ;;  %763 = vperm.xlu0 %2550, %v759_v3   ;;  %v857_v6 = vld [vmem:[%s3530_s5] sm:$0xf]  ;;  %856 = vst [vmem:[#allocation3] sm:$0x3f] %v855_v5 }
  0x9a   : > { %858 = vst [vmem:[#allocation4] sm:$0xf] %v857_v6  ;;  %v2271_v7 = vld [vmem:[%s3586_s30] ss:$0 sm:$0xff] }
 0x114   : > { %v764_v8 = vpop.permute.xlu0 %763 }
 0x115   : > { %v772_v9 = vmul.f32 %v2271_v7, %v764_v8 }
 0x159   : > { %v849_v10 = vpop.f32.mrf.mxu0 }
 0x15a   : > { %v853_v11 = vadd.f32 %v849_v10, %v772_v9 }
 0x15b   : > { %v2383_v12 = vpop.f32.mrf.mxu0 }
 0x15c   : > { %854 = vst [vmem:[#allocation2] sm:$0xff] %v853_v11 }
 0x15d PF: > { %v2555_v13 = vld [vmem:[%s3222_s12 + $0xac] ss:$12 sps:$4 sm:$0xff]   ;;  %v2557_v14 = vld [vmem:[%s3222_s12 + $0xa8] ss:$12 sps:$4 sm:$0xff]   ;;  %v2924_v15 = vmov 0   ;;  %v2925_v17 = vmov 0.0  }
 0x15e   : > { %1104 = vmatprep.mubr.bf16.mxu0 %v2924_v15  ;;  %2551 = vset.pattern.permute.xlu0 %v2924_v15  ;;  %v2558_v16 = vld [vmem:[%s3222_s12 + $0x94] ss:$12 sps:$4 sm:$0xff]   ;;  %v2560_v18 = vld [vmem:[%s3222_s12 + $0x90] ss:$12 sps:$4 sm:$0xff]   ;;  %vm2926_vm3 = vmmov 0   ;;  %p859_p9 = scmp.ge.s32.totalorder %s3117_s4, 1 }
 0x15f   : > { %1072 = vmatprep.subr.bf16.mxu0 %v2555_v13  ;;  %2384 = vmatprep.subr.bf16.mxu1 %v2925_v17  ;;  %v2561_v19 = vld [vmem:[%s3222_s12 + $0x7c] ss:$12 sps:$4 sm:$0xff]   ;;  %p860_p8 = scmp.le.s32.totalorder %s3117_s4, 3  ;;  %v2563_v20 = vld [vmem:[%s3222_s12 + $0x78] ss:$12 sps:$4 sm:$0xff]   ;;  %vm1534_vm5 = vcmask 1043456  }
 0x160   : > { %1073 = vmatpush1.bf16.msra.mxu0 %v2557_v14  ;;  %2400 = vmatprep.mubr.msk.bf16.mxu1 %vm2926_vm3, %v2925_v17  ;;  %v2564_v21 = vld [vmem:[%s3222_s12 + $0x64] ss:$12 sps:$4 sm:$0xff]   ;;  %v2566_v22 = vld [vmem:[%s3222_s12 + $0x60] ss:$12 sps:$4 sm:$0xff]   ;;  %v2569_v24 = vld [vmem:[%s3222_s12 + $0x48] ss:$12 sps:$4 sm:$0xff]  }
 0x161   : > { %1074 = vmatprep.subr.bf16.mxu0 %v2558_v16  ;;  %2552 = vset.pattern.permute.xlu1 %v2924_v15  ;;  %p861_p10 = pnand %p860_p8, %p859_p9  ;;  %v2567_v23 = vld [vmem:[%s3222_s12 + $0x4c] ss:$12 sps:$4 sm:$0xff]   ;;  %v2570_v25 = vld [vmem:[%s3222_s12 + $0x34] ss:$12 sps:$4 sm:$0xff]   ;;  %v2572_v26 = vld [vmem:[%s3222_s12 + $0x30] ss:$12 sps:$4 sm:$0xff]  }
 0x162   : > { %v2573_v29 = vld [vmem:[%s3222_s12 + $0x1c] ss:$12 sps:$4 sm:$0xff]   ;;  %v2575_v30 = vld [vmem:[%s3222_s12 + $0x18] ss:$12 sps:$4 sm:$0xff]   ;;  %v2578_v35 = vld [vmem:[%s3222_s12] ss:$12 sps:$4 sm:$0xff]  }
 0x163   : > { %s2274_s28 = scalar_select %p861_p10, 0, 1  ;;  %v863_v28 = vld [vmem:[#allocation2] sm:$0xff]  ;;  %v2603_v32 = vld [vmem:[%s3222_s12 + $0xb0] ss:$12 sps:$4 sm:$0xff]   ;;  %vm1688_vm6 = vcmask 1042432  }
 0x164   : > { %1075 = vmatpush1.bf16.msra.mxu0 %v2560_v18  ;;  %v864_v31 = vmax.f32 %v863_v28, 0.0  ;;  %v2576_v33 = vld [vmem:[%s3222_s12 + $0x4] ss:$12 sps:$4 sm:$0xff]   ;;  %2385 = vmatpush3.bf16.msra.mxu1 %v2603_v32  ;;  %v2581_v37 = vld [vmem:[%s3228_s10 + $0x74] ss:$8 sps:$4 sm:$0xff]   ;;  %vm1510_vm9 = vcmask 62464  }
 0x165   : > { %1076 = vmatprep.subr.bf16.mxu0 %v2561_v19  ;;  %v3285_v27 = vstv %s2274_s28  ;;  %v2604_v34 = vld [vmem:[%s3222_s12 + $0x98] ss:$12 sps:$4 sm:$0xff]   ;;  %2386 = vmatprep.subr.bf16.mxu1 %v2925_v17  ;;  %v2605_v38 = vld [vmem:[%s3222_s12 + $0x80] ss:$12 sps:$4 sm:$0xff]   ;;  %v2606_v42 = vld [vmem:[%s3222_s12 + $0x68] ss:$12 sps:$4 sm:$0xff]  }
 0x166   : > { %vm867_vm4 = vcmp.eq.s32.totalorder %v3285_v27, 1  ;;  %v2579_v40 = vld [vmem:[%s3228_s10 + $0x70] ss:$8 sps:$4 sm:$0xff]   ;;  %v2584_v41 = vld [vmem:[%s3228_s10 + $0x64] ss:$8 sps:$4 sm:$0xff]   ;;  %vm1665_vm11 = vcmask 48128  }
 0x167   : > { %v868_v36 = vsel %vm867_vm4, %v864_v31, %v863_v28  ;;  %v2582_v43 = vld [vmem:[%s3228_s10 + $0x60] ss:$8 sps:$4 sm:$0xff]   ;;  %v2587_v44 = vld [vmem:[%s3228_s10 + $0x54] ss:$8 sps:$4 sm:$0xff]   ;;  %v2585_v46 = vld [vmem:[%s3228_s10 + $0x50] ss:$8 sps:$4 sm:$0xff]  }
 0x168   : > { %1077 = vmatpush1.bf16.msra.mxu0 %v2563_v20  ;;  %2387 = vmatpush3.bf16.msra.mxu1 %v2604_v34  ;;  %v869_v39 = vpack.c.bf16 %v868_v36, %v868_v36  ;;  %v2607_v45 = vld [vmem:[%s3222_s12 + $0x50] ss:$12 sps:$4 sm:$0xff]   ;;  %v2590_v47 = vld [vmem:[%s3228_s10 + $0x44] ss:$8 sps:$4 sm:$0xff]   ;;  %v2588_v49 = vld [vmem:[%s3228_s10 + $0x40] ss:$8 sps:$4 sm:$0xff]  }
 0x169   : > { %1078 = vmatprep.subr.bf16.mxu0 %v2564_v21  ;;  %2388 = vmatprep.subr.bf16.mxu1 %v2925_v17  ;;  %v2608_v48 = vld [vmem:[%s3222_s12 + $0x38] ss:$12 sps:$4 sm:$0xff]   ;;  %v2593_v50 = vld [vmem:[%s3228_s10 + $0x34] ss:$8 sps:$4 sm:$0xff]   ;;  %v2609_v51 = vld [vmem:[%s3222_s12 + $0x20] ss:$12 sps:$4 sm:$0xff]  }
 0x16a   : > { %v2591_v52 = vld [vmem:[%s3228_s10 + $0x30] ss:$8 sps:$4 sm:$0xff]   ;;  %v2596_v53 = vld [vmem:[%s3228_s10 + $0x24] ss:$8 sps:$4 sm:$0xff]   ;;  %v2610_v54 = vld [vmem:[%s3222_s12 + $0x8] ss:$12 sps:$4 sm:$0xff]  }
 0x16b   : > { %v2613_v55 = vld [vmem:[%s3230_s26 + $0x74] ss:$8 sps:$4 sm:$0xff]   ;;  %v2594_v56 = vld [vmem:[%s3228_s10 + $0x20] ss:$8 sps:$4 sm:$0xff]   ;;  %v2611_v59 = vld [vmem:[%s3230_s26 + $0x70] ss:$8 sps:$4 sm:$0xff]  }
 0x16c   : > { %1079 = vmatpush1.bf16.msra.mxu0 %v2566_v22  ;;  %2389 = vmatpush3.bf16.msra.mxu1 %v2605_v38  ;;  %v2599_v57 = vld [vmem:[%s3228_s10 + $0x14] ss:$8 sps:$4 sm:$0xff]   ;;  %v2616_v60 = vld [vmem:[%s3230_s26 + $0x64] ss:$8 sps:$4 sm:$0xff]   ;;  %v2597_v61 = vld [vmem:[%s3228_s10 + $0x10] ss:$8 sps:$4 sm:$0xff]  }
 0x16d   : > { %1080 = vmatprep.subr.bf16.mxu0 %v2567_v23  ;;  %2390 = vmatprep.subr.bf16.mxu1 %v2925_v17  ;;  %v870_v58 = vld [vmem:[#allocation3] sm:$0x3f]  ;;  %v2602_v63 = vld [vmem:[%s3228_s10 + $0x4] ss:$8 sps:$4 sm:$0xff]   ;;  %v2614_v0 = vld [vmem:[%s3230_s26 + $0x60] ss:$8 sps:$4 sm:$0xff]  }
 0x16e   : > { %v871_v62 = vmax.f32 %v870_v58, 0.0  ;;  %v2619_v1 = vld [vmem:[%s3230_s26 + $0x54] ss:$8 sps:$4 sm:$0xff]   ;;  %v2600_v2 = vld [vmem:[%s3228_s10] ss:$8 sps:$4 sm:$0xff]   ;;  %vm1530_vm13 = vcmask 64512  }
 0x16f   : > { %v2617_v4 = vld [vmem:[%s3230_s26 + $0x50] ss:$8 sps:$4 sm:$0xff]   ;;  %v2622_v6 = vld [vmem:[%s3230_s26 + $0x44] ss:$8 sps:$4 sm:$0xff]   ;;  %v2620_v7 = vld [vmem:[%s3230_s26 + $0x40] ss:$8 sps:$4 sm:$0xff]  }
 0x170   : > { %1081 = vmatpush1.bf16.msra.mxu0 %v2569_v24  ;;  %2391 = vmatpush3.bf16.msra.mxu1 %v2606_v42  ;;  %v872_v3 = vsel %vm867_vm4, %v871_v62, %v870_v58  ;;  %v2625_v8 = vld [vmem:[%s3230_s26 + $0x34] ss:$8 sps:$4 sm:$0xff]   ;;  %v2623_v9 = vld [vmem:[%s3230_s26 + $0x30] ss:$8 sps:$4 sm:$0xff]   ;;  %v2628_v10 = vld [vmem:[%s3230_s26 + $0x24] ss:$8 sps:$4 sm:$0xff]  }
 0x171   : > { %1082 = vmatprep.subr.bf16.mxu0 %v2570_v25  ;;  %2392 = vmatprep.subr.bf16.mxu1 %v2925_v17  ;;  %v873_v5 = vpack.c.bf16 %v872_v3, %v872_v3  ;;  %v2626_v11 = vld [vmem:[%s3230_s26 + $0x20] ss:$8 sps:$4 sm:$0xff]   ;;  %v2631_v12 = vld [vmem:[%s3230_s26 + $0x14] ss:$8 sps:$4 sm:$0xff]   ;;  %v874_v13 = vld [vmem:[#allocation4] sm:$0xf] }
 0x172   : > { %v2629_v14 = vld [vmem:[%s3230_s26 + $0x10] ss:$8 sps:$4 sm:$0xff]   ;;  %v875_v16 = vmax.f32 %v874_v13, 0.0  ;;  %v2634_v18 = vld [vmem:[%s3230_s26 + $0x4] ss:$8 sps:$4 sm:$0xff]   ;;  %vm1840_vm14 = vcmask 1041408  }
 0x173   : > { %v2632_v19 = vld [vmem:[%s3230_s26] ss:$8 sps:$4 sm:$0xff]   ;;  %s3587_s25 = sld [smem:[#allocation33_spill]]  ;;  %vm1817_vm0 = vcmask 31744   ;;  %p2338_p11 = scmp.ne.s32.totalorder %s3117_s4, 3 }
 0x174   : > { %1083 = vmatpush1.bf16.msra.mxu0 %v2572_v26  ;;  %2393 = vmatpush3.bf16.msra.mxu1 %v2607_v45  ;;  %v876_v20 = vsel %vm867_vm4, %v875_v16, %v874_v13  ;;  %v1395_v22 = vld [vmem:[%s3534_s9] sm:$0x3f]  ;;  %vm1971_vm4 = vcmask 60416  }
 0x175   : > { %1084 = vmatprep.subr.bf16.mxu0 %v2573_v29  ;;  %2394 = vmatprep.subr.bf16.mxu1 %v2925_v17  ;;  %v877_v21 = vpack.c.bf16 %v876_v20, %v876_v20  ;;  %v1405_v23 = vld [vmem:[%s3532_s7] sm:$0xff] }
 0x176   : > { %1398 = vperm.xlu1 %2552, %v1395_v22   ;;  %v3360_v26 = vld [vmem:[%s3241_s0] sm:$0xf] }
 0x177   : > { %v1579_v36 = vrot.slane %v3360_v26, 1 }
 0x178   : > { %1085 = vmatpush1.bf16.msra.mxu0 %v2575_v30  ;;  %2395 = vmatpush3.bf16.msra.mxu1 %v2608_v48 }
 0x179   : > { %1086 = vmatprep.subr.bf16.mxu0 %v2576_v33  ;;  %2396 = vmatprep.subr.bf16.mxu1 %v2925_v17 }
 0x17a   : > { %1408 = vperm.xlu1 %2552, %v1405_v23  }
 0x17c   : > { %1087 = vmatpush1.bf16.msra.mxu0 %v2578_v35  ;;  %2397 = vmatpush3.bf16.msra.mxu1 %v2609_v51 }
 0x17d   : > { %1233 = vmatprep.subr.bf16.mxu0 %v2581_v37  ;;  %2398 = vmatprep.subr.bf16.mxu1 %v2925_v17 }
 0x17f   : > { %1105 = vmatmul.mubr.bf16.vlgmr.msra.gmra.mxu0 %v869_v39 }
 0x180   : > { %1234 = vmatpush1.bf16.msra.mxu0 %v2579_v40  ;;  %1265 = vmatprep.mubr.bf16.mxu0 %v2924_v15 }
 0x181   : > { %1235 = vmatprep.subr.bf16.mxu0 %v2584_v41  ;;  %2399 = vmatpush3.bf16.msra.mxu1 %v2610_v54  ;;  %v3386_v54 = vld [vmem:[%s3531_s6] ss:$0 sm:$0xff] }
 0x182   : > { %1354 = vmatprep.subr.bf16.mxu1 %v2613_v55 }
 0x184   : > { %1236 = vmatpush1.bf16.msra.mxu0 %v2582_v43  ;;  %2401 = vmatmul.mubr.bf16.vlgmr.msra.gmra.mxu1 %v869_v39 }
 0x185   : > { %1237 = vmatprep.subr.bf16.mxu0 %v2587_v44  ;;  %1355 = vmatpush1.bf16.msra.mxu1 %v2611_v59 }
 0x186   : > { %1386 = vmatprep.mubr.bf16.mxu1 %v2924_v15  ;;  %1356 = vmatprep.subr.bf16.mxu1 %v2616_v60 }
 0x188   : > { %1238 = vmatpush1.bf16.msra.mxu0 %v2585_v46  ;;  %v2927_v46 = vmov 1  }
 0x189   : > { %1239 = vmatprep.subr.bf16.mxu0 %v2590_v47  ;;  %1357 = vmatpush1.bf16.msra.mxu1 %v2614_v0  ;;  %v1501_v47 = vlaneseq }
 0x18a   : > { %1358 = vmatprep.subr.bf16.mxu1 %v2619_v1  ;;  %2553 = vset.pattern.permute.xlu1 %v2927_v46 }
 0x18b   : > { %v3377_v48 = vshrl.u32 %v1501_v47, 7 }
 0x18c   : > { %1240 = vmatpush1.bf16.msra.mxu0 %v2588_v49 }
 0x18d   : > { %1241 = vmatprep.subr.bf16.mxu0 %v2593_v50  ;;  %1359 = vmatpush1.bf16.msra.mxu1 %v2617_v4  ;;  %v3380_v49 = vsub.s32 0, %v3377_v48 }
 0x18e   : > { %1360 = vmatprep.subr.bf16.mxu1 %v2622_v6 }
 0x190   : > { %1242 = vmatpush1.bf16.msra.mxu0 %v2591_v52 }
 0x191   : > { %1243 = vmatprep.subr.bf16.mxu0 %v2596_v53  ;;  %1361 = vmatpush1.bf16.msra.mxu1 %v2620_v7 }
 0x192   : > { %1362 = vmatprep.subr.bf16.mxu1 %v2625_v8 }
 0x194   : > { %1244 = vmatpush1.bf16.msra.mxu0 %v2594_v56 }
 0x195   : > { %1245 = vmatprep.subr.bf16.mxu0 %v2599_v57  ;;  %1363 = vmatpush1.bf16.msra.mxu1 %v2623_v9 }
 0x196   : > { %1364 = vmatprep.subr.bf16.mxu1 %v2628_v10 }
 0x198   : > { %1246 = vmatpush1.bf16.msra.mxu0 %v2597_v61 }
 0x199   : > { %1247 = vmatprep.subr.bf16.mxu0 %v2602_v63  ;;  %1365 = vmatpush1.bf16.msra.mxu1 %v2626_v11 }
 0x19a   : > { %1366 = vmatprep.subr.bf16.mxu1 %v2631_v12 }
 0x19c   : > { %1248 = vmatpush1.bf16.msra.mxu0 %v2600_v2  ;;  %v2332_v2 = vld [vmem:[%s3533_s8] ss:$0 sm:$0xff] }
 0x19d   : > { %2415 = vmatprep.subr.mxu0 %v2925_v17  ;;  %1367 = vmatpush1.bf16.msra.mxu1 %v2629_v14 }
 0x19e   : > { %1368 = vmatprep.subr.bf16.mxu1 %v2634_v18 }
 0x19f   : > { %1266 = vmatmul.mubr.bf16.vlgmr.msra.gmra.mxu0 %v873_v5 }
 0x1a0   : > { %2417 = vmatprep.mubr.msk.f32.mxu0 %vm2926_vm3, %v2925_v17 }
 0x1a1   : > { %1369 = vmatpush1.bf16.msra.mxu1 %v2632_v19 }
 0x1a2   : > { %2404 = vmatprep.subr.mxu1 %v2925_v17 }
 0x1a4   : > { %1387 = vmatmul.mubr.bf16.vlgmr.msra.gmra.mxu1 %v877_v21  ;;  %v1415_v21 = vld [vmem:[%s3536_s11] sm:$0xf] }
 0x1a5   : > { %2406 = vmatprep.mubr.msk.f32.mxu1 %vm2926_vm3, %v2925_v17 }
 0x1f1   : > { %v1399_v52 = vpop.permute.xlu1 %1398 }
 0x1f2   : > { %vm1404_vm7 = vcmp.eq.s32.totalorder %v1399_v52, %v3386_v54 }
 0x1f5   : > { %v3396_v3 = vpop.permute.xlu1 %1408 }
 0x1f6   : > { %vm1414_vm12 = vcmp.eq.s32.totalorder %v3396_v3, %v2332_v2 }
 0x23f   : > { %v1106_v24 = vpop.f32.mrf.mxu0 }
 0x240   : > { %v1525_v25 = vpack.c.bf16 %v1106_v24, %v1106_v24  ;;  %2405 = vmatpush3.xpose.msra.mxu1 %v1106_v24 }
 0x241   : > { %v3362_v27 = vpop.f32.mrf.mxu0  ;;  %2409 = vmatprep.subr.bf16.mxu1 %v2925_v17 }
 0x242   : > { %v1536_v28 = vsel %vm1534_vm5, %v1525_v25, 0 }
 0x243   : > { %v1110_v29 = vpop.f32.mrf.mxu0  ;;  %2407 = vmatmul.mubr.f32.vlgmr.msra.gmra.mxu1 %v3360_v26 }
 0x244   : > { %2410 = vmatpush3.bf16.msra.mxu1 %v1536_v28  ;;  %2411 = vmatprep.mubr.msk.bf16.mxu1 %vm2926_vm3, %v2925_v17  ;;  %v1147_v31 = vpop.f32.mrf.mxu1 }
 0x245   : > { %v1111_v30 = vpop.f32.mrf.mxu0  ;;  %2426 = vmatprep.subr.mxu1 %v2925_v17 }
 0x246   : > { %v2402_v32 = vpop.f32.mrf.mxu1  ;;  %v1732_v30 = vrot.slane %v3360_v26, 3 }
 0x248   : > { %v1150_v33 = vpop.f32.mrf.mxu1 }
 0x24a   : > { %v2403_v34 = vpop.f32.mrf.mxu1 }
 0x25f   : > { %v1267_v35 = vpop.f32.mrf.mxu0 }
 0x260   : > { %v1680_v37 = vpack.c.bf16 %v1267_v35, %v1267_v35  ;;  %2416 = vmatpush3.xpose.msra.mxu0 %v1267_v35 }
 0x261   : > { %v1269_v38 = vpop.f32.mrf.mxu0  ;;  %2420 = vmatprep.subr.bf16.mxu0 %v2925_v17 }
 0x262   : > { %1498 = vperm.xlu0 %2551, %v1269_v38   ;;  %v1690_v39 = vsel %vm1688_vm6, %v1680_v37, 0  ;;  %v1986_v37 = vpack.c.bf16 %v3362_v27, %v3362_v27  ;;  %v1885_v38 = vrot.slane %v3360_v26, 2 }
 0x263   : > { %v1271_v40 = vpop.f32.mrf.mxu0  ;;  %2418 = vmatmul.mubr.f32.vlgmr.msra.gmra.mxu0 %v1579_v36 }
 0x264   : > { %2421 = vmatpush3.bf16.msra.mxu0 %v1690_v39  ;;  %2422 = vmatprep.mubr.msk.bf16.mxu0 %vm2926_vm3, %v2925_v17  ;;  %v3375_v42 = vpop.f32.mrf.mxu1  ;;  %v1995_v39 = vsel %vm1534_vm5, %v1986_v37, 0  ;;  %v3434_v40 = vld [vmem:[%s3246_s2] sm:$0xf] }
 0x265   : > { %v1272_v41 = vpop.f32.mrf.mxu0  ;;  %2437 = vmatprep.subr.mxu0 %v2925_v17  ;;  %v1832_v29 = vpack.c.bf16 %v3375_v42, %v3375_v42 }
 0x266   : > { %1653 = vperm.xlu0 %2551, %v1147_v31   ;;  %v1390_v43 = vpop.f32.mrf.mxu1  ;;  %v1529_v41 = vrot.slane %v3434_v40, %v3380_v49 }
 0x268   : > { %v1392_v44 = vpop.f32.mrf.mxu1 }
 0x26a   : > { %v1393_v45 = vpop.f32.mrf.mxu1 }
 0x2dd   : > { %v1499_v53 = vpop.permute.xlu0 %1498 }
 0x2e1   : > { %v1654_v63 = vpop.permute.xlu0 %1653 }
 0x303   : > { %v1492_v50 = vpop.f32.mrf.mxu1 }
 0x304   : > { %v1504_v51 = vrot.slane %v1492_v50, %v3380_v49 }
 0x305   : > { %v2408_v55 = vpop.f32.mrf.mxu1 }
 0x306   : > { %v1505_v56 = vadd.f32 %v1504_v51, %v1499_v53 }
 0x308   : > { %vm1506_vm8 = vcmp.gt.f32.partialorder %v1505_v56, 0.0  ;;  %v1507_v57 = vmul.f32 0.2, %v1505_v56 }
 0x30a   : > { %v1508_v58 = vsel %vm1506_vm8, %v1505_v56, %v1507_v57 }
 0x30b   : > { %v1509_v59 = vsel %vm1404_vm7, %v1508_v58, -1e+30 }
 0x30c   : > { %v1511_v60 = vsel %vm1510_vm9, %v1509_v59, -inf }
 0x30d   : > { %1512 = vmax.xlane.f32.xlu0 %v1511_v60 }
 0x323   : > { %v1647_v61 = vpop.f32.mrf.mxu0 }
 0x324   : > { %v1659_v62 = vrot.slane %v1647_v61, %v3380_v49 }
 0x325   : > { %v2419_v0 = vpop.f32.mrf.mxu0 }
 0x326   : > { %v1660_v1 = vadd.f32 %v1659_v62, %v1654_v63 }
 0x328   : > { %v1662_v4 = vmul.f32 0.2, %v1660_v1  ;;  %vm1661_vm10 = vcmp.gt.f32.partialorder %v1660_v1, 0.0 }
 0x32a   : > { %v1663_v5 = vsel %vm1661_vm10, %v1660_v1, %v1662_v4 }
 0x32b   : > { %v1664_v6 = vsel %vm1414_vm12, %v1663_v5, -1e+30 }
 0x32c   : > { %v1666_v7 = vsel %vm1665_vm11, %v1664_v6, -inf }
 0x32d   : > { %1667 = vmax.xlane.f32.xlu1 %v1666_v7 }
 0x33e   : > { %1805 = vperm.xlu1 %2553, %v1147_v31   ;;  %v1842_v31 = vsel %vm1840_vm14, %v1832_v29, 0 }
 0x342   : > { %2554 = vset.pattern.permute.xlu1 %v2924_v15 }
 0x343   : > { %1417 = vperm.xlu1 %2554, %v1415_v21  }
 0x396   : > { %v1513_v8 = vpop.xlane.xlu0 %1512 }
 0x397   : > { %v1514_v9 = vsub.f32 %v1509_v59, %v1513_v8 }
 0x399   : > { %v1515_v10 = vmul.f32 1.442695, %v1514_v9 }
 0x39b   : > { %2635 = vpow2.f32 %v1515_v10 }
 0x3a8   : > { %v2636_v11 = vpop.eup %2635 }
 0x3a9   : > { %v1517_v12 = vsel %vm1404_vm7, %v2636_v11, 0.0 }
 0x3aa   : > { %v1518_v13 = vsel %vm1510_vm9, %v1517_v12, 0.0 }
 0x3ab   : > { %1519 = vadd.xlane.f32.xlu0 %v1518_v13 }
 0x3b6   : > { %v1668_v14 = vpop.xlane.xlu1 %1667 }
 0x3b7   : > { %v1669_v16 = vsub.f32 %v1664_v6, %v1668_v14 }
 0x3b9   : > { %v1670_v18 = vmul.f32 1.442695, %v1669_v16 }
 0x3ba   : > { %v1806_v47 = vpop.permute.xlu1 %1805 }
 0x3bb   : > { %2637 = vpow2.f32 %v1670_v18 }
 0x3be   : > { %v1418_v1 = vpop.permute.xlu1 %1417 }
 0x3bf   : > { %vm1419_vm2 = vcmp.eq.s32.totalorder %v1418_v1, %v3386_v54  ;;  %v1683_v54 = vsub.s32 1, %v3377_v48 }
 0x3c8   : > { %v2638_v19 = vpop.eup %2637 }
 0x3c9   : > { %v1672_v20 = vsel %vm1414_vm12, %v2638_v19, 0.0 }
 0x3ca   : > { %v1673_v15 = vsel %vm1665_vm11, %v1672_v20, 0.0 }
 0x3cb   : > { %1674 = vadd.xlane.f32.xlu0 %v1673_v15 }
 0x3e1   : > { %1959 = vperm.xlu0 %2551, %v1390_v43  }
 0x434   : > { %v1520_v22 = vpop.xlane.xlu0 %1519 }
 0x435   : > { %v1521_v23 = vadd.f32 1e-16, %v1520_v22 }
 0x437   : > { %2639 = vrcp.f32 %v1521_v23 }
 0x444   : > { %v2640_v24 = vpop.eup %2639 }
 0x445   : > { %v1523_v25 = vmul.f32 %v2640_v24, %v1517_v12 }
 0x447   : > { %v1524_v28 = vpack.c.bf16 %v1523_v25, %v1523_v25 }
 0x449   : > { %2412 = vmatmul.mubr.msk.bf16.vlgmr.msra.gmra.mxu1 %vm1530_vm13, %v1524_v28 }
 0x44a   : > { %2427 = vmatpush3.xpose.msra.mxu1 %v3375_v42  ;;  %2428 = vmatprep.mubr.msk.f32.mxu1 %vm2926_vm3, %v2925_v17 }
 0x44b   : > { %2431 = vmatprep.subr.bf16.mxu1 %v2925_v17 }
 0x451   : > { %2429 = vmatmul.mubr.f32.vlgmr.msra.gmra.mxu1 %v1732_v30 }
 0x452   : > { %2432 = vmatpush3.bf16.msra.mxu1 %v1842_v31  ;;  %2433 = vmatprep.mubr.msk.bf16.mxu1 %vm2926_vm3, %v2925_v17  ;;  %v1835_v31 = vsub.s32 3, %v3377_v48 }
 0x454   : > { %v1675_v32 = vpop.xlane.xlu0 %1674 }
 0x455   : > { %v1676_v33 = vadd.f32 1e-16, %v1675_v32  ;;  %v1684_v32 = vrot.slane %v3434_v40, %v1683_v54 }
 0x457   : > { %2641 = vrcp.f32 %v1676_v33  ;;  %v1836_v33 = vrot.slane %v3434_v40, %v1835_v31 }
 0x45c   : > { %v1960_v62 = vpop.permute.xlu0 %1959 }
 0x464   : > { %v2642_v34 = vpop.eup %2641 }
 0x465   : > { %v1678_v35 = vmul.f32 %v2642_v34, %v1672_v20 }
 0x467   : > { %v1679_v36 = vpack.c.bf16 %v1678_v35, %v1678_v35 }
 0x469   : > { %2423 = vmatmul.mubr.msk.bf16.vlgmr.msra.gmra.mxu0 %vm1665_vm11, %v1679_v36 }
 0x46a   : > { %2438 = vmatpush3.xpose.msra.mxu0 %v3362_v27  ;;  %2439 = vmatprep.mubr.msk.f32.mxu0 %vm2926_vm3, %v2925_v17 }
 0x46b   : > { %2442 = vmatprep.subr.bf16.mxu0 %v2925_v17 }
 0x471   : > { %2440 = vmatmul.mubr.f32.vlgmr.msra.gmra.mxu0 %v1885_v38 }
 0x472   : > { %2443 = vmatpush3.bf16.msra.mxu0 %v1995_v39  ;;  %2444 = vmatprep.mubr.msk.bf16.mxu0 %vm2926_vm3, %v2925_v17  ;;  %v2333_v17 = vld [vmem:[%s3587_s25] ss:$0 sm:$0xff] }
 0x473   : > { %vm1425_vm1 = vcmp.eq.s32.totalorder %v3396_v3, %v2333_v17 }
 0x509   : > { %v1572_v42 = vpop.f32.mrf.mxu1 }
 0x50a   : > { %v3438_v43 = vadd.f32 %v1572_v42, %v1529_v41  ;;  %v1989_v42 = vsub.s32 2, %v3377_v48 }
 0x50b   : > { %v2413_v44 = vpop.f32.mrf.mxu1 }
 0x50c   : > { %2038 = vst [vmem:[#allocation3] sm:$0x3f] %v3438_v43  ;;  %v1990_v44 = vrot.slane %v3434_v40, %v1989_v42 }
 0x50d   : > { %v1575_v27 = vpop.f32.mrf.mxu1 }
 0x50f   : > { %v2414_v26 = vpop.f32.mrf.mxu1 }
 0x511   : > { %v1800_v45 = vpop.f32.mrf.mxu1 }
 0x512   : > { %v1811_v46 = vrot.slane %v1800_v45, %v3380_v49 }
 0x513   : > { %v2430_v50 = vpop.f32.mrf.mxu1 }
 0x514   : > { %v1812_v51 = vadd.f32 %v1811_v46, %v1806_v47 }
 0x516   : > { %vm1813_vm15 = vcmp.gt.f32.partialorder %v1812_v51, 0.0  ;;  %v1814_v52 = vmul.f32 0.2, %v1812_v51 }
 0x518   : > { %v1815_v53 = vsel %vm1813_vm15, %v1812_v51, %v1814_v52 }
 0x519   : > { %v1816_v55 = vsel %vm1425_vm1, %v1815_v53, -1e+30 }
 0x51a   : > { %v1818_v56 = vsel %vm1817_vm0, %v1816_v55, -inf }
 0x51b   : > { %1819 = vmax.xlane.f32.xlu1 %v1818_v56 }
 0x529   : > { %v1726_v57 = vpop.f32.mrf.mxu0 }
 0x52a   : > { %v1727_v35 = vadd.f32 %v1726_v57, %v1684_v32 }
 0x52b   : > { %v2424_v58 = vpop.f32.mrf.mxu0 }
 0x52d   : > { %v1729_v59 = vpop.f32.mrf.mxu0 }
 0x52f   : > { %v2425_v60 = vpop.f32.mrf.mxu0 }
 0x531   : > { %v1953_v61 = vpop.f32.mrf.mxu0 }
 0x532   : > { %v1965_v63 = vrot.slane %v1953_v61, %v3380_v49 }
 0x533   : > { %v2441_v0 = vpop.f32.mrf.mxu0 }
 0x534   : > { %v1966_v2 = vadd.f32 %v1965_v63, %v1960_v62 }
 0x536   : > { %vm1967_vm3 = vcmp.gt.f32.partialorder %v1966_v2, 0.0  ;;  %v1968_v4 = vmul.f32 0.2, %v1966_v2 }
 0x538   : > { %v1969_v5 = vsel %vm1967_vm3, %v1966_v2, %v1968_v4 }
 0x539   : > { %v1970_v6 = vsel %vm1419_vm2, %v1969_v5, -1e+30 }
 0x53a   : > { %v1972_v7 = vsel %vm1971_vm4, %v1970_v6, -inf }
 0x53b   : > { %1973 = vmax.xlane.f32.xlu0 %v1972_v7 }
 0x5a4   : > { %v1820_v8 = vpop.xlane.xlu1 %1819 }
 0x5a5   : > { %v1821_v9 = vsub.f32 %v1816_v55, %v1820_v8 }
 0x5a7   : > { %v1822_v10 = vmul.f32 1.442695, %v1821_v9 }
 0x5a9   : > { %2643 = vpow2.f32 %v1822_v10 }
 0x5b6   : > { %v2644_v49 = vpop.eup %2643 }
 0x5b7   : > { %v1824_v11 = vsel %vm1425_vm1, %v2644_v49, 0.0 }
 0x5b8   : > { %v1825_v12 = vsel %vm1817_vm0, %v1824_v11, 0.0 }
 0x5b9   : > { %1826 = vadd.xlane.f32.xlu0 %v1825_v12 }
 0x5c4   : > { %v1974_v13 = vpop.xlane.xlu0 %1973 }
 0x5c5   : > { %v1975_v14 = vsub.f32 %v1970_v6, %v1974_v13 }
 0x5c7   : > { %v1976_v16 = vmul.f32 1.442695, %v1975_v14 }
 0x5c9   : > { %2645 = vpow2.f32 %v1976_v16 }
 0x5d6   : > { %v2646_v18 = vpop.eup %2645 }
 0x5d7   : > { %v1978_v19 = vsel %vm1419_vm2, %v2646_v18, 0.0 }
 0x5d8   : > { %v1979_v20 = vsel %vm1971_vm4, %v1978_v19, 0.0 }
 0x5d9   : > { %1980 = vadd.xlane.f32.xlu1 %v1979_v20 }
 0x642   : > { %v1827_v15 = vpop.xlane.xlu0 %1826 }
 0x643   : > { %v1828_v21 = vadd.f32 1e-16, %v1827_v15 }
 0x645   : > { %2647 = vrcp.f32 %v1828_v21 }
 0x652   : > { %v2648_v22 = vpop.eup %2647 }
 0x653   : > { %v1830_v3 = vmul.f32 %v2648_v22, %v1824_v11 }
 0x655   : > { %v1831_v23 = vpack.c.bf16 %v1830_v3, %v1830_v3 }
 0x657   : > { %2434 = vmatmul.mubr.msk.bf16.vlgmr.msra.gmra.mxu1 %vm1817_vm0, %v1831_v23 }
 0x662   : > { %v1981_v24 = vpop.xlane.xlu1 %1980 }
 0x663   : > { %v1982_v25 = vadd.f32 1e-16, %v1981_v24 }
 0x665   : > { %2649 = vrcp.f32 %v1982_v25 }
 0x672   : > { %v2650_v28 = vpop.eup %2649 }
 0x673   : > { %v1984_v29 = vmul.f32 %v2650_v28, %v1978_v19 }
 0x675   : > { %v1985_v30 = vpack.c.bf16 %v1984_v29, %v1984_v29 }
 0x677   : > { %2445 = vmatmul.mubr.msk.bf16.vlgmr.msra.gmra.mxu0 %vm1530_vm13, %v1985_v30 }
 0x717   : > { %v1878_v34 = vpop.f32.mrf.mxu1 }
 0x718   : > { %v1879_v36 = vadd.f32 %v1878_v34, %v1836_v33 }
 0x719   : > { %v2435_v37 = vpop.f32.mrf.mxu1 }
 0x71a   : > { %v1884_v38 = vadd.f32 %v1879_v36, %v1727_v35 }
 0x71b   : > { %v1881_v39 = vpop.f32.mrf.mxu1 }
 0x71c   : > { %2037 = vst [vmem:[#allocation2] sm:$0xff] %v1884_v38 }
 0x71d   : > { %v2436_v41 = vpop.f32.mrf.mxu1 }
 0x737   : > { %v2031_v27 = vpop.f32.mrf.mxu0 }
 0x738   : > { %v2032_v26 = vadd.f32 %v2031_v27, %v1990_v44 }
 0x739   : > { %v2446_v45 = vpop.f32.mrf.mxu0  ;;  %2043 = sbr.rel (%p2338_p11) target bundleno = 1856 (0x740), region = 112 }
 0x73a   : > { %2039 = vst [vmem:[#allocation4] sm:$0xf] %v2032_v26 }
 0x73b   : > { %v2034_v46 = vpop.f32.mrf.mxu0 }
 0x73d   : > { %v2447_v47 = vpop.f32.mrf.mxu0 }
 0x73e   : > { %2044 = vst [vmem:[#allocation13] sm:$0xff] %v1884_v38  ;;  %2045 = vst [vmem:[#allocation14] sm:$0x3f] %v3438_v43 }
 0x73f   : > { %2046 = vst [vmem:[#allocation16] sm:$0xf] %v2032_v26 }
 0x740 PF: > { %p2339_p12 = scmp.ne.s32.totalorder %s3117_s4, 4 }
 0x742   : > { %2050 = sbr.rel (%p2339_p12) target bundleno = 1864 (0x748), region = 116 }
 0x747   : > { %2051 = vst [vmem:[#allocation17] sm:$0xff] %v1884_v38 }
 0x748 PF: > { %p2494_p2 = scmp.eq.s32.totalorder %s3117_s4, 4  ;;  %s2928_s18 = smov [#allocation14]  }
 0x749   : > { %s2070_s27 = sshll.u32 %s2928_s18, 4  ;;  %s2929_s1 = smov [#allocation13]   ;;  %s2071_s27 = int_to_ptr.vmem [resolvable:$true] %s2070_s27 }
 0x74a   : > { %s2059_s23 = sshll.u32 %s2929_s1, 4  ;;  %s2761_s24 = scalar_lea.vmem %s2071_s27, 128  ;;  %s2060_s23 = int_to_ptr.vmem [resolvable:$true] %s2059_s23 }
 0x74b   : > { %p2762_p1 = scmp.ne.s32.totalorder %s2071_s27, %s2761_s24  ;;  %p2768_p0 = scmp.lt.s32.totalorder %s2071_s27, %s2071_s27 }
 0x74c   : > { %p2769_p4 = scmp.lt.s32.totalorder %s2761_s24, %s2761_s24 }
 0x74d   : > { %p2763_p13 = pnand %p2762_p1, %p2494_p2 }
 0x74e   : > { %p2770_p6 = por %p2769_p4, %p2768_p0 }
 0x74f   : > { %p2764_p7 = pneg %p2763_p13 }
 0x751   : > { %p2771_p5 = pnand %p2770_p6, %p2764_p7 }
 0x753   : > { %2774 = shalt.err (!%p2771_p5)
}
 0x754   : > { %s3588_s12 = sld [smem:[#allocation37_spill]]  ;;  %s2785_s10 = scalar_lea.vmem %s2060_s23, 128 }
 0x755   : > { %p2786_p3 = scmp.ne.s32.totalorder %s2060_s23, %s2785_s10  ;;  %p2792_p10 = scmp.lt.s32.totalorder %s2060_s23, %s2060_s23 }
 0x756   : > { %p2793_p11 = scmp.lt.s32.totalorder %s2785_s10, %s2785_s10 }
 0x757   : > { %p2787_p9 = pnand %p2786_p3, %p2494_p2 }
 0x758   : > { %p2794_p12 = por %p2793_p11, %p2792_p10 }
 0x759   : > { %p2788_p8 = pneg %p2787_p9 }
 0x75a   : > { %2464 = dma.vmem_to_hbm [thread:$0]  (%p2494_p2), %s2071_s27, 128, %s3588_s12, [#allocation15]  }
 0x75b   : > { %p2795_p1 = pnand %p2794_p12, %p2788_p8 }
 0x75d   : > { %2798 = shalt.err (!%p2795_p1)
}
 0x75e   : > { %s3589_s0 = sld [smem:[#allocation36_spill]]  ;;  %s2930_s19 = smov [#allocation16]  }
 0x75f   : > { %s2081_s17 = sshll.u32 %s2930_s19, 4  ;;  %s2931_s13 = smov [#allocation17]   ;;  %s2082_s17 = int_to_ptr.vmem [resolvable:$true] %s2081_s17 }
 0x760   : > { %s2092_s20 = sshll.u32 %s2931_s13, 4  ;;  %s2809_s29 = scalar_lea.vmem %s2082_s17, 64  ;;  %s2093_s20 = int_to_ptr.vmem [resolvable:$true] %s2092_s20 }
 0x761   : > { %p2810_p13 = scmp.ne.s32.totalorder %s2082_s17, %s2809_s29  ;;  %p2816_p4 = scmp.lt.s32.totalorder %s2082_s17, %s2082_s17 }
 0x762   : > { %p2817_p6 = scmp.lt.s32.totalorder %s2809_s29, %s2809_s29 }
 0x763   : > { %p2811_p7 = pnand %p2810_p13, %p2494_p2 }
 0x764   : > { %2462 = dma.vmem_to_hbm [thread:$0]  (%p2494_p2), %s2060_s23, 128, %s3589_s0, [#allocation7]  }
 0x765   : > { %p2812_p0 = pneg %p2811_p7  ;;  %p2818_p5 = por %p2817_p6, %p2816_p4 }
 0x767   : > { %p2819_p3 = pnand %p2818_p5, %p2812_p0 }
 0x769   : > { %2822 = shalt.err (!%p2819_p3)
}
 0x76a   : > { %s3590_s25 = sld [smem:[#allocation38_spill]]  ;;  %s2833_s18 = scalar_lea.vmem %s2093_s20, 128 }
 0x76b   : > { %p2834_p9 = scmp.ne.s32.totalorder %s2093_s20, %s2833_s18  ;;  %p2840_p11 = scmp.lt.s32.totalorder %s2093_s20, %s2093_s20 }
 0x76c   : > { %p2841_p12 = scmp.lt.s32.totalorder %s2833_s18, %s2833_s18 }
 0x76d   : > { %p2835_p8 = pnand %p2834_p9, %p2494_p2 }
 0x76e   : > { %p2842_p1 = por %p2841_p12, %p2840_p11 }
 0x76f   : > { %p2836_p10 = pneg %p2835_p8 }
 0x770   : > { %2466 = dma.vmem_to_hbm [thread:$0]  (%p2494_p2), %s2082_s17, 64, %s3590_s25, [#allocation15]  }
 0x771   : > { %p2843_p13 = pnand %p2842_p1, %p2836_p10 }
 0x773   : > { %2846 = shalt.err (!%p2843_p13)
}
 0x774   : > { %s3591_s23 = sld [smem:[#allocation39_spill]] }
 0x77a   : > { %2468 = dma.vmem_to_hbm [thread:$0]  (%p2494_p2), %s2093_s20, 128, %s3591_s23, [#allocation18]  }
 0x77b   : > { %2886 = dma.done.wait (%p2494_p2), [#allocation7], 128  }
 0x77c   : > { %2888 = vsyncadd (%p2494_p2), [#allocation7], 4294967168 }
 0x77d   : > { %2890 = dma.done.wait (%p2494_p2), [#allocation15], 192  }
 0x77e   : > { %2892 = vsyncadd (%p2494_p2), [#allocation15], 4294967104 }
 0x77f   : > { %2894 = dma.done.wait (%p2494_p2), [#allocation18], 128  }
 0x780   : > { %2896 = vsyncadd (%p2494_p2), [#allocation18], 4294967168 }
 0x781 PF: > { %s3592_s24 = sld [smem:[#allocation26_spill]]  ;;  %s3595_s1 = smov %s2903_s22 }
 0x782   : > { %s3593_s30 = sld [smem:[#allocation25_spill]] }
 0x783   : > { %s3594_s23 = sld [smem:[#allocation27_spill]] }
 0x787   : > { %p38_p7 = scmp.ge.s32.totalorder %s3592_s24, 7  }
 0x788   : > { %s3596_s22 = smov %s3593_s30 }
 0x789   :  { %40 = sbr.rel (!%p38_p7) target bundleno = 22 (0x16), region = 196 }
 0x78e   :  { %2117 = vsyncpa [#allocation6], 1 }
 0x78f   :  { %2119 = vsyncpa [#allocation6 + $0x1], 1 }
 0x790   :  { %2120 = vsyncpa [#allocation9], 1 }
 0x791   :  { %2122 = vsyncpa [#allocation9 + $0x1], 1 }
 0x792   :  { %2123 = vsyncpa [#allocation12], 1 }
 0x793   :  { %2125 = vsyncpa [#allocation12 + $0x1], 1 }
 0x794   :  { %2126 = vsyncpa [#allocation7], 1 }
 0x795   :  { %2128 = vsyncpa [#allocation7 + $0x1], 1 }
 0x796   :  { %2129 = vsyncpa [#allocation15], 1 }
 0x797   :  { %2130 = vsyncpa [#allocation18], 1 }

</bundles_post_ra>
